<compile_context>
chip_gen: v5e
topology: v5e:2x2
jax: 0.10.0
libtpu: 0.0.40
codegen_flags: <defaults>
</compile_context>

<pallas_src>
import functools

import jax
import jax.numpy as jnp
from jax.experimental import pallas as pl
from jax.experimental.pallas import tpu as pltpu


# -----------------------------------------------------------------------------
# small helpers
# -----------------------------------------------------------------------------
def _round_up(x, m):
    return ((x + m - 1) // m) * m


def _pick_row_tile(n, target):
    """Largest multiple of 8 that divides n and is <= target, else n (full dim)."""
    t = min(target, n)
    t -= t % 8
    while t >= 8:
        if n % t == 0:
            return t
        t -= 8
    return n


def _vmem_cap_bytes():
    """Per-generation scoped-VMEM cap, leaving headroom for compiler scratch."""
    try:
        phys = int(pltpu.get_tpu_info().vmem_capacity_bytes)
    except Exception:  # pragma: no cover — conservative fallback
        phys = 64 * 1024 * 1024
    if phys >= 100 * 1024 * 1024:          # v5e / v6e: 128 MiB physical per core
        return 100 * 1024 * 1024
    return min(phys, 48 * 1024 * 1024)     # v7x: 64 MiB physical -> cap at 48 MiB


def _ffn_compute_dtype():
    """bf16 VPU/EUP exists on v6e/v7x; keep f32 transcendentals on older chips."""
    try:
        kind = jax.devices()[0].device_kind.lower()
    except Exception:  # pragma: no cover
        kind = ""
    if ("v6" in kind) or ("v7" in kind):
        return jnp.bfloat16
    return jnp.float32


# -----------------------------------------------------------------------------
# Kernel 1: transformer encoder layer + fused two-head classifier epilogue.
# Grid = (batch "parallel", query_tiles "arbitrary").  K/V hoisted into VMEM
# scratch once per batch element.  bf16 MXU operands, f32 accumulation/stats.
# -----------------------------------------------------------------------------
def _encoder_heads_kernel(
    x_ref, mask_ref,
    wq_ref, wk_ref, wv_ref, wo_ref,
    bq_ref, bk_ref, bv_ref, bo_ref,
    w1_ref, b1_ref, w2_ref, b2_ref,
    ln1g_ref, ln1b_ref, ln2g_ref, ln2b_ref,
    wh_ref, bh_ref,
    out_ref,
    k_scr, v_scr,
    *, tq, ffn_dtype,
):
    f32 = jnp.float32
    bf16 = jnp.bfloat16
    qi = pl.program_id(1)

    # Hoisted K/V projection: full-sequence (S, H) matmuls run ONCE per batch
    # element (qi == 0), cached in bf16 scratch and reused by all query tiles.
    @pl.when(qi == 0)
    def _():
        xkv = x_ref[0]                                            # (S, H) bf16
        k = jnp.dot(xkv, wk_ref[...], preferred_element_type=f32) + bk_ref[...]
        v = jnp.dot(xkv, wv_ref[...], preferred_element_type=f32) + bv_ref[...]
        k_scr[...] = k.astype(bf16)
        v_scr[...] = v.astype(bf16)

    row0 = pl.multiple_of(qi * tq, tq)
    xq = x_ref[0, pl.ds(row0, tq), :]                             # (TQ, H) bf16
    mask = mask_ref[0]                                            # (1, S)  f32

    h = xq.shape[-1]
    scale = 1.0 / jnp.sqrt(jnp.float32(h))
    key_bias = (1.0 - mask) * jnp.float32(-1e9)

    q = (jnp.dot(xq, wq_ref[...], preferred_element_type=f32)
         + bq_ref[...]).astype(bf16)

    # q @ K^T via NT dot_general (no explicit transpose of the cached K).
    # TODO(synk): on v5e verify with pl.lower_as_mlir that this NT contraction
    #             does not lower to an XLU transpose; if it does, cache K
    #             pre-transposed as (H, S) once per batch instead.
    scores = jax.lax.dot_general(
        q, k_scr[...],
        dimension_numbers=(((1,), (1,)), ((), ())),
        preferred_element_type=f32) * scale + key_bias

    # Softmax in f32; approx reciprocal uses the EUP slot (essentially free).
    m = jnp.max(scores, axis=-1, keepdims=True)
    p = jnp.exp(scores - m)
    p = p * pl.reciprocal(jnp.sum(p, axis=-1, keepdims=True), approx=True)

    attn = jnp.dot(p.astype(bf16), v_scr[...], preferred_element_type=f32)
    attn = (jnp.dot(attn.astype(bf16), wo_ref[...], preferred_element_type=f32)
            + bo_ref[...])

    # Residual + layernorm 1 (f32 statistics).
    y = xq.astype(f32) + attn
    mu = jnp.mean(y, axis=-1, keepdims=True)
    var = jnp.mean((y - mu) ** 2, axis=-1, keepdims=True)
    y = (y - mu) * jax.lax.rsqrt(var + 1e-12) * ln1g_ref[...] + ln1b_ref[...]

    # FFN: bf16 matmuls; intermediate/GELU in bf16 on v6e/v7x, f32 on v5e.
    f = jnp.dot(y.astype(bf16), w1_ref[...], preferred_element_type=f32) + b1_ref[...]
    f = jax.nn.gelu(f.astype(ffn_dtype)).astype(bf16)
    f = jnp.dot(f, w2_ref[...], preferred_element_type=f32) + b2_ref[...]

    # Residual + layernorm 2.
    z = y + f
    mu2 = jnp.mean(z, axis=-1, keepdims=True)
    var2 = jnp.mean((z - mu2) ** 2, axis=-1, keepdims=True)
    z = (z - mu2) * jax.lax.rsqrt(var2 + 1e-12) * ln2g_ref[...] + ln2b_ref[...]

    # Fused fc_seq + fc_ent epilogue: one lane-dense (TQ, P) matmul + bias.
    out_ref[0] = (jnp.dot(z.astype(bf16), wh_ref[...], preferred_element_type=f32)
                  + bh_ref[...])


def _encoder_vmem_estimate(S, H, F, P, TQ, weights_bytes, ffn_bytes):
    streamed = 2 * (S * H * 2 + S * 4 + TQ * P * 4)   # x / mask / out blocks (2x-buffered)
    scratch = 2 * S * H * 2                           # hoisted K, V (bf16)
    inter = (TQ * S * 4                               # attention scores (f32)
             + 2 * TQ * F * ffn_bytes                 # FFN intermediate (+ 1 copy)
             + 8 * TQ * H * 4                         # q/attn/y/z f32 working set
             + 2 * S * H * 4)                         # K/V f32 temporaries at qi == 0
    return weights_bytes + streamed + scratch + int(1.5 * inter)


def encoder_with_heads(x_bf16, attention_mask, enc, w_heads, b_heads):
    """x_bf16: (B, S, H) bf16 -> lane-padded logits (B, S, P) f32, P = 128*k."""
    B, S, H = x_bf16.shape
    F = enc["w1"].shape[1]
    P = w_heads.shape[1]
    mask_f = attention_mask.astype(jnp.float32).reshape(B, 1, S)

    weight_operands = (
        enc["wq"], enc["wk"], enc["wv"], enc["wo"],
        enc["bq"], enc["bk"], enc["bv"], enc["bo"],
        enc["w1"], enc["b1"], enc["w2"], enc["b2"],
        enc["ln1_g"], enc["ln1_b"], enc["ln2_g"], enc["ln2_b"],
        w_heads, b_heads,
    )
    operands = (x_bf16, mask_f) + weight_operands
    weights_bytes = sum(int(a.size) * a.dtype.itemsize for a in weight_operands)

    cap = _vmem_cap_bytes()
    ffn_dtype = _ffn_compute_dtype()
    ffn_bytes = jnp.dtype(ffn_dtype).itemsize

    # Query-tile selection: take TQ = S when the footprint fits the VMEM cap
    # (single K/V pass, no slicing overhead); otherwise the largest tile that fits.
    TQ = _pick_row_tile(S, 8)
    for target in (S, 1024, 512, 256, 128, 64, 32, 16, 8):
        cand = S if target >= S else _pick_row_tile(S, target)
        if _encoder_vmem_estimate(S, H, F, P, cand, weights_bytes, ffn_bytes) \
                + (4 << 20) <= cap:
            TQ = cand
            break

    limit = int(min(cap, max(
        _encoder_vmem_estimate(S, H, F, P, TQ, weights_bytes, ffn_bytes) + (4 << 20),
        32 * 1024 * 1024)))

    # Advisory cost estimate so XLA overlaps the embedding gather / glue ops.
    flops = int(2 * B * S * (4 * H * H + 2 * H * F + 2 * S * H + H * P))
    transcend = int(B * S * (S + F))
    bytes_accessed = int(x_bf16.size * 2 + mask_f.size * 4
                         + weights_bytes + B * S * P * 4)
    cost = pl.CostEstimate(flops=flops, transcendentals=transcend,
                           bytes_accessed=bytes_accessed)

    kernel = functools.partial(_encoder_heads_kernel, tq=TQ, ffn_dtype=ffn_dtype)

    def run(single_buffer_weights):
        def wspec(shape):
            idx = lambda b, qi: (0,) * len(shape)
            if single_buffer_weights:
                # Grid-invariant weights: single buffering halves their VMEM
                # footprint vs. default double-buffering.
                return pl.BlockSpec(shape, idx, pipeline_mode=pl.Buffered(1))
            return pl.BlockSpec(shape, idx)

        in_specs = [
            pl.BlockSpec((1, S, H), lambda b, qi: (b, 0, 0)),     # full seq (Q/K/V source)
            pl.BlockSpec((1, 1, S), lambda b, qi: (b, 0, 0)),     # attention mask
            wspec((H, H)), wspec((H, H)), wspec((H, H)), wspec((H, H)),   # wq wk wv wo
            wspec((1, H)), wspec((1, H)), wspec((1, H)), wspec((1, H)),   # bq bk bv bo
            wspec((H, F)), wspec((1, F)), wspec((F, H)), wspec((1, H)),   # w1 b1 w2 b2
            wspec((1, H)), wspec((1, H)), wspec((1, H)), wspec((1, H)),   # ln1/ln2 g,b
            wspec((H, P)), wspec((1, P)),                                 # fused head W, b
        ]
        out_spec = pl.BlockSpec((1, TQ, P), lambda b, qi: (b, qi, 0))

        return pl.pallas_call(
            kernel,
            out_shape=jax.ShapeDtypeStruct((B, S, P), jnp.float32),
            grid=(B, S // TQ),
            in_specs=in_specs,
            out_specs=out_spec,
            scratch_shapes=[pltpu.VMEM((S, H), jnp.bfloat16),      # hoisted K
                            pltpu.VMEM((S, H), jnp.bfloat16)],     # hoisted V
            compiler_params=pltpu.CompilerParams(
                dimension_semantics=("parallel", "arbitrary"),
                vmem_limit_bytes=limit,
            ),
            cost_estimate=cost,
        )(*operands)

    try:
        return run(single_buffer_weights=True)
    except Exception:  # pragma: no cover — fall back if this build rejects Buffered(1)
        return run(single_buffer_weights=False)


# -----------------------------------------------------------------------------
# Kernel 2: FUSED masked cross-entropy for both heads, one sweep over the
# lane-padded logits.  Fully parallel over row blocks (sharded across TCs on
# v7x); per-block partial (sum, count) pairs are reduced in the wrapper.
# -----------------------------------------------------------------------------
def _two_head_ce_kernel(logits_ref, seq_lab_ref, ent_lab_ref,
                        seq_sum_ref, seq_cnt_ref, ent_sum_ref, ent_cnt_ref,
                        *, seq_classes, ent_classes):
    logits = logits_ref[...]                       # (TN, P) f32, lane-padded
    tn, p = logits.shape
    col = jax.lax.broadcasted_iota(jnp.int32, (tn, p), 1)

    def head_partials(labels, col_start, ncls):
        in_range = jnp.logical_and(col >= col_start, col < col_start + ncls)
        masked = jnp.where(in_range, logits, jnp.float32(-1e30))
        m = jnp.max(masked, axis=-1, keepdims=True)
        lse = m + jnp.log(jnp.sum(jnp.exp(masked - m), axis=-1, keepdims=True))
        onehot = (col == labels + col_start).astype(jnp.float32)   # -100 rows -> all zero
        picked = jnp.sum(logits * onehot, axis=-1, keepdims=True)
        valid = (labels >= 0).astype(jnp.float32)
        per_row = (lse - picked) * valid
        return (jnp.sum(per_row, axis=0, keepdims=True),
                jnp.sum(valid, axis=0, keepdims=True))             # each (1, 1)

    s_sum, s_cnt = head_partials(seq_lab_ref[...], 0, seq_classes)
    e_sum, e_cnt = head_partials(ent_lab_ref[...], seq_classes, ent_classes)

    seq_sum_ref[0] = s_sum
    seq_cnt_ref[0] = s_cnt
    ent_sum_ref[0] = e_sum
    ent_cnt_ref[0] = e_cnt


def masked_cross_entropy_two_heads(logits_pad, seq_labels, ent_labels,
                                   *, num_seq, num_ent):
    """Mean CE per head over rows with label != -100; single pass over logits."""
    N, P = logits_pad.shape
    TN = _pick_row_tile(N, 1024)                   # large tiles -> near HBM roofline
    nb = N // TN
    seq2d = seq_labels.reshape(N, 1).astype(jnp.int32)
    ent2d = ent_labels.reshape(N, 1).astype(jnp.int32)

    cap = _vmem_cap_bytes()
    per_step = TN * (P * 4 + 2 * 4)
    limit = int(min(cap, max(8 * per_step + (4 << 20), 16 * 1024 * 1024)))

    kernel = functools.partial(_two_head_ce_kernel,
                               seq_classes=num_seq, ent_classes=num_ent)
    partial_shape = jax.ShapeDtypeStruct((nb, 1, 1), jnp.float32)
    partial_spec = pl.BlockSpec((1, 1, 1), lambda i: (i, 0, 0))

    seq_sum, seq_cnt, ent_sum, ent_cnt = pl.pallas_call(
        kernel,
        out_shape=(partial_shape, partial_shape, partial_shape, partial_shape),
        grid=(nb,),
        in_specs=[pl.BlockSpec((TN, P), lambda i: (i, 0)),
                  pl.BlockSpec((TN, 1), lambda i: (i, 0)),
                  pl.BlockSpec((TN, 1), lambda i: (i, 0))],
        out_specs=(partial_spec, partial_spec, partial_spec, partial_spec),
        compiler_params=pltpu.CompilerParams(
            dimension_semantics=("parallel",),
            vmem_limit_bytes=limit,
        ),
    )(logits_pad, seq2d, ent2d)

    # TODO(synk): PyTorch CrossEntropyLoss(mean) returns NaN when no token is
    #             valid; this returns 0 on that degenerate case.
    seq_loss = jnp.sum(seq_sum) / jnp.maximum(jnp.sum(seq_cnt), 1.0)
    ent_loss = jnp.sum(ent_sum) / jnp.maximum(jnp.sum(ent_cnt), 1.0)
    return seq_loss, ent_loss


# -----------------------------------------------------------------------------
# Model wrapper (deterministic synthetic weights).
# -----------------------------------------------------------------------------
class TwoHeadTokenClassifier:
    def __init__(self, vocab_size, hidden_size, num_tags_seq, num_tags_ent,
                 using_custom_types=False, seed=0):
        self.hidden_size = hidden_size
        self.num_tags_seq = num_tags_seq
        self.num_tags_ent = num_tags_ent
        self.using_custom_types = using_custom_types

        H = hidden_size
        F = 4 * hidden_size
        P = _round_up(max(num_tags_seq + num_tags_ent, 1), 128)
        self.head_pad = P

        keys = jax.random.split(jax.random.PRNGKey(seed), 16)
        f32, bf16 = jnp.float32, jnp.bfloat16
        norm = lambda k, shape, s: (s * jax.random.normal(k, shape)).astype(f32)

        # Embedding table (token gather stays in the XLA wrapper).
        self.embedding = norm(keys[0], (vocab_size, H), 0.02)

        # Synthetic encoder layer; MXU-facing weights stored bf16, rest f32.
        self.enc = {
            "wq": norm(keys[1], (H, H), 0.02).astype(bf16),
            "wk": norm(keys[2], (H, H), 0.02).astype(bf16),
            "wv": norm(keys[3], (H, H), 0.02).astype(bf16),
            "wo": norm(keys[4], (H, H), 0.02).astype(bf16),
            "bq": jnp.zeros((1, H), f32), "bk": jnp.zeros((1, H), f32),
            "bv": jnp.zeros((1, H), f32), "bo": jnp.zeros((1, H), f32),
            "w1": norm(keys[5], (H, F), 0.02).astype(bf16),
            "b1": jnp.zeros((1, F), f32),
            "w2": norm(keys[6], (F, H), 0.02).astype(bf16),
            "b2": jnp.zeros((1, H), f32),
            "ln1_g": jnp.ones((1, H), f32), "ln1_b": jnp.zeros((1, H), f32),
            "ln2_g": jnp.ones((1, H), f32), "ln2_b": jnp.zeros((1, H), f32),
        }

        # fc_seq / fc_ent fused into one lane-dense (H, P) head, zero-padded.
        w_seq = norm(keys[7], (H, num_tags_seq), 0.05)
        w_ent = norm(keys[8], (H, num_tags_ent), 0.05)
        b_seq = jnp.zeros((num_tags_seq,), f32)
        b_ent = jnp.zeros((num_tags_ent,), f32)
        w_heads = jnp.zeros((H, P), f32)
        w_heads = w_heads.at[:, :num_tags_seq].set(w_seq)
        w_heads = w_heads.at[:, num_tags_seq:num_tags_seq + num_tags_ent].set(w_ent)
        b_heads = jnp.zeros((1, P), f32)
        b_heads = b_heads.at[0, :num_tags_seq].set(b_seq)
        b_heads = b_heads.at[0, num_tags_seq:num_tags_seq + num_tags_ent].set(b_ent)
        self.w_heads = w_heads.astype(bf16)
        self.b_heads = b_heads                     # bias added post-accumulation in f32

    def __call__(self, input_ids, attention_mask, seq_labels=None, ent_labels=None):
        B, S = input_ids.shape
        Ts, Te = self.num_tags_seq, self.num_tags_ent

        # Token embedding gather (glue; no clean Pallas equivalent for vocab gather).
        x = self.embedding[input_ids].astype(jnp.bfloat16)            # (B, S, H)

        # Dropout is identity at inference time (classifier_dropout applies in training).
        logits_pad = encoder_with_heads(x, attention_mask, self.enc,
                                        self.w_heads, self.b_heads)   # (B, S, P) f32

        seq_logits = logits_pad[..., :Ts]
        ent_logits = logits_pad[..., Ts:Ts + Te]
        if seq_labels is None:
            return seq_logits, ent_logits

        # --- loss path: mirrors the PyTorch masking (ignore_index = -100) ---
        ignore = jnp.int32(-100)
        logits_flat = logits_pad.reshape(B * S, self.head_pad)

        seq_active = attention_mask.reshape(-1) == 1
        seq_active_labels = jnp.where(seq_active, seq_labels.reshape(-1), ignore)

        ent_active = ent_labels.reshape(-1) > 0
        ent_active_labels = jnp.where(ent_active, (ent_labels - 1).reshape(-1), ignore)

        seq_loss, ent_loss = masked_cross_entropy_two_heads(
            logits_flat, seq_active_labels, ent_active_labels,
            num_seq=Ts, num_ent=Te)

        if self.using_custom_types:
            return ent_loss
        return seq_loss + ent_loss


# -----------------------------------------------------------------------------
if __name__ == "__main__":
    B, S, H, V = 2, 8, 32, 100
    NUM_TAGS_SEQ, NUM_TAGS_ENT = 5, 9

    key = jax.random.PRNGKey(0)
    k_ids, k_seq, k_ent = jax.random.split(key, 3)

    input_ids = jax.random.randint(k_ids, (B, S), 0, V, dtype=jnp.int32)
    attention_mask = jnp.concatenate(
        [jnp.ones((B, S - 2), jnp.int32), jnp.zeros((B, 2), jnp.int32)], axis=1)
    seq_labels = jax.random.randint(k_seq, (B, S), 0, NUM_TAGS_SEQ, dtype=jnp.int32)
    ent_labels = jax.random.randint(k_ent, (B, S), 0, NUM_TAGS_ENT + 1, dtype=jnp.int32)

    model = TwoHeadTokenClassifier(V, H, NUM_TAGS_SEQ, NUM_TAGS_ENT, seed=0)

    # inference path: returns (seq_logits, ent_logits)
    seq_logits, ent_logits = model(input_ids, attention_mask)
    jax.block_until_ready((seq_logits, ent_logits))
    assert seq_logits.shape == (B, S, NUM_TAGS_SEQ)
    assert ent_logits.shape == (B, S, NUM_TAGS_ENT)

    # training path: returns scalar loss (seq_loss + ent_loss)
    loss = model(input_ids, attention_mask, seq_labels, ent_labels)
    jax.block_until_ready(loss)
    assert loss.shape == ()
    assert bool(jnp.isfinite(loss))

    print("KERNEL_OK")
</pallas_src>

<mosaic_0001>
module attributes {stable_mosaic.version = 11 : i64} {
  func.func @_encoder_heads_kernel(%arg0: i32, %arg1: i32, %arg2: memref<1x8x32xbf16, #tpu.memory_space<vmem>>, %arg3: memref<1x1x8xf32, #tpu.memory_space<vmem>>, %arg4: memref<32x32xbf16, #tpu.memory_space<vmem>>, %arg5: memref<32x32xbf16, #tpu.memory_space<vmem>>, %arg6: memref<32x32xbf16, #tpu.memory_space<vmem>>, %arg7: memref<32x32xbf16, #tpu.memory_space<vmem>>, %arg8: memref<1x32xf32, #tpu.memory_space<vmem>>, %arg9: memref<1x32xf32, #tpu.memory_space<vmem>>, %arg10: memref<1x32xf32, #tpu.memory_space<vmem>>, %arg11: memref<1x32xf32, #tpu.memory_space<vmem>>, %arg12: memref<32x128xbf16, #tpu.memory_space<vmem>>, %arg13: memref<1x128xf32, #tpu.memory_space<vmem>>, %arg14: memref<128x32xbf16, #tpu.memory_space<vmem>>, %arg15: memref<1x32xf32, #tpu.memory_space<vmem>>, %arg16: memref<1x32xf32, #tpu.memory_space<vmem>>, %arg17: memref<1x32xf32, #tpu.memory_space<vmem>>, %arg18: memref<1x32xf32, #tpu.memory_space<vmem>>, %arg19: memref<1x32xf32, #tpu.memory_space<vmem>>, %arg20: memref<32x128xbf16, #tpu.memory_space<vmem>>, %arg21: memref<1x128xf32, #tpu.memory_space<vmem>>, %arg22: memref<1x8x128xf32, #tpu.memory_space<vmem>>, %arg23: memref<8x32xbf16, #tpu.memory_space<vmem>>, %arg24: memref<8x32xbf16, #tpu.memory_space<vmem>>) attributes {dimension_semantics = [#tpu.dimension_semantics<parallel>, #tpu.dimension_semantics<arbitrary>], iteration_bounds = array<i64: 2, 1>, scalar_prefetch = 0 : i64, scratch_operands = 2 : i64, tpu.core_type = #tpu.core_type<tc>, window_params = [{transform_indices = @transform_0, window_bounds = array<i64: 1, 8, 32>}, {transform_indices = @transform_1, window_bounds = array<i64: 1, 1, 8>}, {pipeline_mode = #tpu.pipeline_mode<synchronous>, transform_indices = @transform_2, window_bounds = array<i64: 32, 32>}, {pipeline_mode = #tpu.pipeline_mode<synchronous>, transform_indices = @transform_3, window_bounds = array<i64: 32, 32>}, {pipeline_mode = #tpu.pipeline_mode<synchronous>, transform_indices = @transform_4, window_bounds = array<i64: 32, 32>}, {pipeline_mode = #tpu.pipeline_mode<synchronous>, transform_indices = @transform_5, window_bounds = array<i64: 32, 32>}, {pipeline_mode = #tpu.pipeline_mode<synchronous>, transform_indices = @transform_6, window_bounds = array<i64: 1, 32>}, {pipeline_mode = #tpu.pipeline_mode<synchronous>, transform_indices = @transform_7, window_bounds = array<i64: 1, 32>}, {pipeline_mode = #tpu.pipeline_mode<synchronous>, transform_indices = @transform_8, window_bounds = array<i64: 1, 32>}, {pipeline_mode = #tpu.pipeline_mode<synchronous>, transform_indices = @transform_9, window_bounds = array<i64: 1, 32>}, {pipeline_mode = #tpu.pipeline_mode<synchronous>, transform_indices = @transform_10, window_bounds = array<i64: 32, 128>}, {pipeline_mode = #tpu.pipeline_mode<synchronous>, transform_indices = @transform_11, window_bounds = array<i64: 1, 128>}, {pipeline_mode = #tpu.pipeline_mode<synchronous>, transform_indices = @transform_12, window_bounds = array<i64: 128, 32>}, {pipeline_mode = #tpu.pipeline_mode<synchronous>, transform_indices = @transform_13, window_bounds = array<i64: 1, 32>}, {pipeline_mode = #tpu.pipeline_mode<synchronous>, transform_indices = @transform_14, window_bounds = array<i64: 1, 32>}, {pipeline_mode = #tpu.pipeline_mode<synchronous>, transform_indices = @transform_15, window_bounds = array<i64: 1, 32>}, {pipeline_mode = #tpu.pipeline_mode<synchronous>, transform_indices = @transform_16, window_bounds = array<i64: 1, 32>}, {pipeline_mode = #tpu.pipeline_mode<synchronous>, transform_indices = @transform_17, window_bounds = array<i64: 1, 32>}, {pipeline_mode = #tpu.pipeline_mode<synchronous>, transform_indices = @transform_18, window_bounds = array<i64: 32, 128>}, {pipeline_mode = #tpu.pipeline_mode<synchronous>, transform_indices = @transform_19, window_bounds = array<i64: 1, 128>}, {transform_indices = @transform_20, window_bounds = array<i64: 1, 8, 128>}]} {
    %c0_i32 = arith.constant 0 : i32
    %0 = arith.cmpi eq, %arg1, %c0_i32 : i32
    %1 = arith.extui %0 : i1 to i32
    %c0_i32_0 = arith.constant 0 : i32
    %2 = arith.cmpi ne, %1, %c0_i32_0 : i32
    scf.if %2 {
      %c0_66 = arith.constant 0 : index
      %c0_67 = arith.constant 0 : index
      %c0_68 = arith.constant 0 : index
      %132 = vector.load %arg2[%c0_66, %c0_67, %c0_68] : memref<1x8x32xbf16, #tpu.memory_space<vmem>>, vector<1x8x32xbf16>
      %133 = vector.shape_cast %132 : vector<1x8x32xbf16> to vector<8x32xbf16>
      %c0_69 = arith.constant 0 : index
      %c0_70 = arith.constant 0 : index
      %134 = vector.load %arg5[%c0_69, %c0_70] : memref<32x32xbf16, #tpu.memory_space<vmem>>, vector<32x32xbf16>
      %cst_71 = arith.constant dense<0.000000e+00> : vector<8x32xf32>
      %135 = tpu.matmul %133, %134, %cst_71 {dimension_numbers = #tpu.dot_dimension_numbers<[1], [0], [0], [1], [0, 0, 1, 1], [], []>} : vector<8x32xbf16>, vector<32x32xbf16>, vector<8x32xf32> -> vector<8x32xf32>
      %c0_72 = arith.constant 0 : index
      %c0_73 = arith.constant 0 : index
      %136 = vector.load %arg9[%c0_72, %c0_73] : memref<1x32xf32, #tpu.memory_space<vmem>>, vector<1x32xf32>
      %137 = vector.broadcast %136 : vector<1x32xf32> to vector<8x32xf32>
      %138 = arith.addf %135, %137 : vector<8x32xf32>
      %c0_74 = arith.constant 0 : index
      %c0_75 = arith.constant 0 : index
      %139 = vector.load %arg6[%c0_74, %c0_75] : memref<32x32xbf16, #tpu.memory_space<vmem>>, vector<32x32xbf16>
      %cst_76 = arith.constant dense<0.000000e+00> : vector<8x32xf32>
      %140 = tpu.matmul %133, %139, %cst_76 {dimension_numbers = #tpu.dot_dimension_numbers<[1], [0], [0], [1], [0, 0, 1, 1], [], []>} : vector<8x32xbf16>, vector<32x32xbf16>, vector<8x32xf32> -> vector<8x32xf32>
      %c0_77 = arith.constant 0 : index
      %c0_78 = arith.constant 0 : index
      %141 = vector.load %arg10[%c0_77, %c0_78] : memref<1x32xf32, #tpu.memory_space<vmem>>, vector<1x32xf32>
      %142 = vector.broadcast %141 : vector<1x32xf32> to vector<8x32xf32>
      %143 = arith.addf %140, %142 : vector<8x32xf32>
      %144 = arith.truncf %138 : vector<8x32xf32> to vector<8x32xbf16>
      %c0_79 = arith.constant 0 : index
      %c0_80 = arith.constant 0 : index
      %145 = vector.load %arg23[%c0_79, %c0_80] : memref<8x32xbf16, #tpu.memory_space<vmem>>, vector<8x32xbf16>
      tpu.vector_store %arg23[%c0_79, %c0_80], %144 {strides = array<i32>} : memref<8x32xbf16, #tpu.memory_space<vmem>>, vector<8x32xbf16>,
      %146 = arith.truncf %143 : vector<8x32xf32> to vector<8x32xbf16>
      %c0_81 = arith.constant 0 : index
      %c0_82 = arith.constant 0 : index
      %147 = vector.load %arg24[%c0_81, %c0_82] : memref<8x32xbf16, #tpu.memory_space<vmem>>, vector<8x32xbf16>
      tpu.vector_store %arg24[%c0_81, %c0_82], %146 {strides = array<i32>} : memref<8x32xbf16, #tpu.memory_space<vmem>>, vector<8x32xbf16>,
    } else {
    }
    %c8_i32 = arith.constant 8 : i32
    %3 = arith.muli %arg1, %c8_i32 : i32
    %4 = tpu.assume_multiple %3, 8 : i32
    %c0 = arith.constant 0 : index
    %5 = arith.index_cast %4 : i32 to index
    %c0_1 = arith.constant 0 : index
    %6 = vector.load %arg2[%c0, %5, %c0_1] : memref<1x8x32xbf16, #tpu.memory_space<vmem>>, vector<1x8x32xbf16>
    %7 = vector.shape_cast %6 : vector<1x8x32xbf16> to vector<8x32xbf16>
    %c0_2 = arith.constant 0 : index
    %c0_3 = arith.constant 0 : index
    %c0_4 = arith.constant 0 : index
    %8 = vector.load %arg3[%c0_2, %c0_3, %c0_4] : memref<1x1x8xf32, #tpu.memory_space<vmem>>, vector<1x1x8xf32>
    %9 = vector.shape_cast %8 : vector<1x1x8xf32> to vector<1x8xf32>
    %cst = arith.constant 3.200000e+01 : f32
    %10 = math.sqrt %cst : f32
    %cst_5 = arith.constant 1.000000e+00 : f32
    %11 = arith.divf %cst_5, %10 : f32
    %cst_6 = arith.constant 1.000000e+00 : f32
    %12 = vector.broadcast %cst_6 : f32 to vector<1x8xf32>
    %13 = arith.subf %12, %9 : vector<1x8xf32>
    %cst_7 = arith.constant -1.000000e+09 : f32
    %14 = vector.broadcast %cst_7 : f32 to vector<1x8xf32>
    %15 = arith.mulf %13, %14 : vector<1x8xf32>
    %c0_8 = arith.constant 0 : index
    %c0_9 = arith.constant 0 : index
    %16 = vector.load %arg4[%c0_8, %c0_9] : memref<32x32xbf16, #tpu.memory_space<vmem>>, vector<32x32xbf16>
    %cst_10 = arith.constant dense<0.000000e+00> : vector<8x32xf32>
    %17 = tpu.matmul %7, %16, %cst_10 {dimension_numbers = #tpu.dot_dimension_numbers<[1], [0], [0], [1], [0, 0, 1, 1], [], []>} : vector<8x32xbf16>, vector<32x32xbf16>, vector<8x32xf32> -> vector<8x32xf32>
    %c0_11 = arith.constant 0 : index
    %c0_12 = arith.constant 0 : index
    %18 = vector.load %arg8[%c0_11, %c0_12] : memref<1x32xf32, #tpu.memory_space<vmem>>, vector<1x32xf32>
    %19 = vector.broadcast %18 : vector<1x32xf32> to vector<8x32xf32>
    %20 = arith.addf %17, %19 : vector<8x32xf32>
    %21 = arith.truncf %20 : vector<8x32xf32> to vector<8x32xbf16>
    %c0_13 = arith.constant 0 : index
    %c0_14 = arith.constant 0 : index
    %22 = vector.load %arg23[%c0_13, %c0_14] : memref<8x32xbf16, #tpu.memory_space<vmem>>, vector<8x32xbf16>
    %cst_15 = arith.constant dense<0.000000e+00> : vector<8x8xf32>
    %23 = tpu.matmul %21, %22, %cst_15 {dimension_numbers = #tpu.dot_dimension_numbers<[1], [1], [0], [0], [0, 0, 1, 0], [], []>} : vector<8x32xbf16>, vector<8x32xbf16>, vector<8x8xf32> -> vector<8x8xf32>
    %24 = vector.broadcast %11 : f32 to vector<8x8xf32>
    %25 = arith.mulf %23, %24 : vector<8x8xf32>
    %26 = vector.broadcast %15 : vector<1x8xf32> to vector<8x8xf32>
    %27 = arith.addf %25, %26 : vector<8x8xf32>
    %cst_16 = arith.constant dense<0xFF800000> : vector<8xf32>
    %28 = vector.multi_reduction <maximumf>, %27, %cst_16 [1] : vector<8x8xf32> to vector<8xf32>
    %29 = vector.shape_cast %28 : vector<8xf32> to vector<8x1xf32>
    %30 = vector.broadcast %29 : vector<8x1xf32> to vector<8x8xf32>
    %31 = arith.subf %27, %30 : vector<8x8xf32>
    %32 = math.exp %31 : vector<8x8xf32>
    %cst_17 = arith.constant dense<0.000000e+00> : vector<8xf32>
    %33 = vector.multi_reduction <add>, %32, %cst_17 [1] : vector<8x8xf32> to vector<8xf32>
    %34 = vector.shape_cast %33 : vector<8xf32> to vector<8x1xf32>
    %35 = tpu.reciprocal %34 {approx = true} : vector<8x1xf32> -> vector<8x1xf32>
    %36 = vector.broadcast %35 : vector<8x1xf32> to vector<8x8xf32>
    %37 = arith.mulf %32, %36 : vector<8x8xf32>
    %38 = arith.truncf %37 : vector<8x8xf32> to vector<8x8xbf16>
    %c0_18 = arith.constant 0 : index
    %c0_19 = arith.constant 0 : index
    %39 = vector.load %arg24[%c0_18, %c0_19] : memref<8x32xbf16, #tpu.memory_space<vmem>>, vector<8x32xbf16>
    %cst_20 = arith.constant dense<0.000000e+00> : vector<8x32xf32>
    %40 = tpu.matmul %38, %39, %cst_20 {dimension_numbers = #tpu.dot_dimension_numbers<[1], [0], [0], [1], [0, 0, 1, 1], [], []>} : vector<8x8xbf16>, vector<8x32xbf16>, vector<8x32xf32> -> vector<8x32xf32>
    %41 = arith.truncf %40 : vector<8x32xf32> to vector<8x32xbf16>
    %c0_21 = arith.constant 0 : index
    %c0_22 = arith.constant 0 : index
    %42 = vector.load %arg7[%c0_21, %c0_22] : memref<32x32xbf16, #tpu.memory_space<vmem>>, vector<32x32xbf16>
    %cst_23 = arith.constant dense<0.000000e+00> : vector<8x32xf32>
    %43 = tpu.matmul %41, %42, %cst_23 {dimension_numbers = #tpu.dot_dimension_numbers<[1], [0], [0], [1], [0, 0, 1, 1], [], []>} : vector<8x32xbf16>, vector<32x32xbf16>, vector<8x32xf32> -> vector<8x32xf32>
    %c0_24 = arith.constant 0 : index
    %c0_25 = arith.constant 0 : index
    %44 = vector.load %arg11[%c0_24, %c0_25] : memref<1x32xf32, #tpu.memory_space<vmem>>, vector<1x32xf32>
    %45 = vector.broadcast %44 : vector<1x32xf32> to vector<8x32xf32>
    %46 = arith.addf %43, %45 : vector<8x32xf32>
    %47 = arith.extf %7 : vector<8x32xbf16> to vector<8x32xf32>
    %48 = arith.addf %47, %46 : vector<8x32xf32>
    %cst_26 = arith.constant dense<0.000000e+00> : vector<8xf32>
    %49 = vector.multi_reduction <add>, %48, %cst_26 [1] : vector<8x32xf32> to vector<8xf32>
    %50 = vector.shape_cast %49 : vector<8xf32> to vector<8x1xf32>
    %cst_27 = arith.constant 3.200000e+01 : f32
    %51 = vector.broadcast %cst_27 : f32 to vector<8x1xf32>
    %52 = arith.divf %50, %51 : vector<8x1xf32>
    %53 = vector.broadcast %52 : vector<8x1xf32> to vector<8x32xf32>
    %54 = arith.subf %48, %53 : vector<8x32xf32>
    %55 = arith.mulf %54, %54 : vector<8x32xf32>
    %cst_28 = arith.constant dense<0.000000e+00> : vector<8xf32>
    %56 = vector.multi_reduction <add>, %55, %cst_28 [1] : vector<8x32xf32> to vector<8xf32>
    %57 = vector.shape_cast %56 : vector<8xf32> to vector<8x1xf32>
    %cst_29 = arith.constant 3.200000e+01 : f32
    %58 = vector.broadcast %cst_29 : f32 to vector<8x1xf32>
    %59 = arith.divf %57, %58 : vector<8x1xf32>
    %60 = vector.broadcast %52 : vector<8x1xf32> to vector<8x32xf32>
    %61 = arith.subf %48, %60 : vector<8x32xf32>
    %cst_30 = arith.constant 9.99999996E-13 : f32
    %62 = vector.broadcast %cst_30 : f32 to vector<8x1xf32>
    %63 = arith.addf %59, %62 : vector<8x1xf32>
    %64 = math.rsqrt %63 : vector<8x1xf32>
    %65 = vector.broadcast %64 : vector<8x1xf32> to vector<8x32xf32>
    %66 = arith.mulf %61, %65 : vector<8x32xf32>
    %c0_31 = arith.constant 0 : index
    %c0_32 = arith.constant 0 : index
    %67 = vector.load %arg16[%c0_31, %c0_32] : memref<1x32xf32, #tpu.memory_space<vmem>>, vector<1x32xf32>
    %68 = vector.broadcast %67 : vector<1x32xf32> to vector<8x32xf32>
    %69 = arith.mulf %66, %68 : vector<8x32xf32>
    %c0_33 = arith.constant 0 : index
    %c0_34 = arith.constant 0 : index
    %70 = vector.load %arg17[%c0_33, %c0_34] : memref<1x32xf32, #tpu.memory_space<vmem>>, vector<1x32xf32>
    %71 = vector.broadcast %70 : vector<1x32xf32> to vector<8x32xf32>
    %72 = arith.addf %69, %71 : vector<8x32xf32>
    %73 = arith.truncf %72 : vector<8x32xf32> to vector<8x32xbf16>
    %c0_35 = arith.constant 0 : index
    %c0_36 = arith.constant 0 : index
    %74 = vector.load %arg12[%c0_35, %c0_36] : memref<32x128xbf16, #tpu.memory_space<vmem>>, vector<32x128xbf16>
    %cst_37 = arith.constant dense<0.000000e+00> : vector<8x128xf32>
    %75 = tpu.matmul %73, %74, %cst_37 {dimension_numbers = #tpu.dot_dimension_numbers<[1], [0], [0], [1], [0, 0, 1, 1], [], []>} : vector<8x32xbf16>, vector<32x128xbf16>, vector<8x128xf32> -> vector<8x128xf32>
    %c0_38 = arith.constant 0 : index
    %c0_39 = arith.constant 0 : index
    %76 = vector.load %arg13[%c0_38, %c0_39] : memref<1x128xf32, #tpu.memory_space<vmem>>, vector<1x128xf32>
    %77 = vector.broadcast %76 : vector<1x128xf32> to vector<8x128xf32>
    %78 = arith.addf %75, %77 : vector<8x128xf32>
    %79 = arith.mulf %78, %78 : vector<8x128xf32>
    %80 = arith.mulf %78, %79 : vector<8x128xf32>
    %cst_40 = arith.constant 4.471500e-02 : f32
    %81 = vector.broadcast %cst_40 : f32 to vector<8x128xf32>
    %82 = arith.mulf %81, %80 : vector<8x128xf32>
    %83 = arith.addf %78, %82 : vector<8x128xf32>
    %cst_41 = arith.constant 0.797884583 : f32
    %84 = vector.broadcast %cst_41 : f32 to vector<8x128xf32>
    %85 = arith.mulf %84, %83 : vector<8x128xf32>
    %86 = math.tanh %85 : vector<8x128xf32>
    %cst_42 = arith.constant 1.000000e+00 : f32
    %87 = vector.broadcast %cst_42 : f32 to vector<8x128xf32>
    %88 = arith.addf %87, %86 : vector<8x128xf32>
    %cst_43 = arith.constant 5.000000e-01 : f32
    %89 = vector.broadcast %cst_43 : f32 to vector<8x128xf32>
    %90 = arith.mulf %89, %88 : vector<8x128xf32>
    %91 = arith.mulf %78, %90 : vector<8x128xf32>
    %92 = arith.truncf %91 : vector<8x128xf32> to vector<8x128xbf16>
    %c0_44 = arith.constant 0 : index
    %c0_45 = arith.constant 0 : index
    %93 = vector.load %arg14[%c0_44, %c0_45] : memref<128x32xbf16, #tpu.memory_space<vmem>>, vector<128x32xbf16>
    %cst_46 = arith.constant dense<0.000000e+00> : vector<8x32xf32>
    %94 = tpu.matmul %92, %93, %cst_46 {dimension_numbers = #tpu.dot_dimension_numbers<[1], [0], [0], [1], [0, 0, 1, 1], [], []>} : vector<8x128xbf16>, vector<128x32xbf16>, vector<8x32xf32> -> vector<8x32xf32>
    %c0_47 = arith.constant 0 : index
    %c0_48 = arith.constant 0 : index
    %95 = vector.load %arg15[%c0_47, %c0_48] : memref<1x32xf32, #tpu.memory_space<vmem>>, vector<1x32xf32>
    %96 = vector.broadcast %95 : vector<1x32xf32> to vector<8x32xf32>
    %97 = arith.addf %94, %96 : vector<8x32xf32>
    %98 = arith.addf %72, %97 : vector<8x32xf32>
    %cst_49 = arith.constant dense<0.000000e+00> : vector<8xf32>
    %99 = vector.multi_reduction <add>, %98, %cst_49 [1] : vector<8x32xf32> to vector<8xf32>
    %100 = vector.shape_cast %99 : vector<8xf32> to vector<8x1xf32>
    %cst_50 = arith.constant 3.200000e+01 : f32
    %101 = vector.broadcast %cst_50 : f32 to vector<8x1xf32>
    %102 = arith.divf %100, %101 : vector<8x1xf32>
    %103 = vector.broadcast %102 : vector<8x1xf32> to vector<8x32xf32>
    %104 = arith.subf %98, %103 : vector<8x32xf32>
    %105 = arith.mulf %104, %104 : vector<8x32xf32>
    %cst_51 = arith.constant dense<0.000000e+00> : vector<8xf32>
    %106 = vector.multi_reduction <add>, %105, %cst_51 [1] : vector<8x32xf32> to vector<8xf32>
    %107 = vector.shape_cast %106 : vector<8xf32> to vector<8x1xf32>
    %cst_52 = arith.constant 3.200000e+01 : f32
    %108 = vector.broadcast %cst_52 : f32 to vector<8x1xf32>
    %109 = arith.divf %107, %108 : vector<8x1xf32>
    %110 = vector.broadcast %102 : vector<8x1xf32> to vector<8x32xf32>
    %111 = arith.subf %98, %110 : vector<8x32xf32>
    %cst_53 = arith.constant 9.99999996E-13 : f32
    %112 = vector.broadcast %cst_53 : f32 to vector<8x1xf32>
    %113 = arith.addf %109, %112 : vector<8x1xf32>
    %114 = math.rsqrt %113 : vector<8x1xf32>
    %115 = vector.broadcast %114 : vector<8x1xf32> to vector<8x32xf32>
    %116 = arith.mulf %111, %115 : vector<8x32xf32>
    %c0_54 = arith.constant 0 : index
    %c0_55 = arith.constant 0 : index
    %117 = vector.load %arg18[%c0_54, %c0_55] : memref<1x32xf32, #tpu.memory_space<vmem>>, vector<1x32xf32>
    %118 = vector.broadcast %117 : vector<1x32xf32> to vector<8x32xf32>
    %119 = arith.mulf %116, %118 : vector<8x32xf32>
    %c0_56 = arith.constant 0 : index
    %c0_57 = arith.constant 0 : index
    %120 = vector.load %arg19[%c0_56, %c0_57] : memref<1x32xf32, #tpu.memory_space<vmem>>, vector<1x32xf32>
    %121 = vector.broadcast %120 : vector<1x32xf32> to vector<8x32xf32>
    %122 = arith.addf %119, %121 : vector<8x32xf32>
    %123 = arith.truncf %122 : vector<8x32xf32> to vector<8x32xbf16>
    %c0_58 = arith.constant 0 : index
    %c0_59 = arith.constant 0 : index
    %124 = vector.load %arg20[%c0_58, %c0_59] : memref<32x128xbf16, #tpu.memory_space<vmem>>, vector<32x128xbf16>
    %cst_60 = arith.constant dense<0.000000e+00> : vector<8x128xf32>
    %125 = tpu.matmul %123, %124, %cst_60 {dimension_numbers = #tpu.dot_dimension_numbers<[1], [0], [0], [1], [0, 0, 1, 1], [], []>} : vector<8x32xbf16>, vector<32x128xbf16>, vector<8x128xf32> -> vector<8x128xf32>
    %c0_61 = arith.constant 0 : index
    %c0_62 = arith.constant 0 : index
    %126 = vector.load %arg21[%c0_61, %c0_62] : memref<1x128xf32, #tpu.memory_space<vmem>>, vector<1x128xf32>
    %127 = vector.broadcast %126 : vector<1x128xf32> to vector<8x128xf32>
    %128 = arith.addf %125, %127 : vector<8x128xf32>
    %c0_63 = arith.constant 0 : index
    %c0_64 = arith.constant 0 : index
    %c0_65 = arith.constant 0 : index
    %129 = vector.load %arg22[%c0_63, %c0_64, %c0_65] : memref<1x8x128xf32, #tpu.memory_space<vmem>>, vector<1x8x128xf32>
    %130 = vector.shape_cast %129 : vector<1x8x128xf32> to vector<8x128xf32>
    %131 = vector.shape_cast %128 : vector<8x128xf32> to vector<1x8x128xf32>
    tpu.vector_store %arg22[%c0_63, %c0_64, %c0_65], %131 {strides = array<i32>} : memref<1x8x128xf32, #tpu.memory_space<vmem>>, vector<1x8x128xf32>,
    return
  }
  func.func @transform_0(%arg0: i32, %arg1: i32) -> (i32, i32, i32) {
    %c0_i32 = arith.constant 0 : i32
    %c0_i32_0 = arith.constant 0 : i32
    %c0_i32_1 = arith.constant 0 : i32
    return %arg0, %c0_i32, %c0_i32_0 : i32, i32, i32
  }
  func.func @transform_1(%arg0: i32, %arg1: i32) -> (i32, i32, i32) {
    %c0_i32 = arith.constant 0 : i32
    %c0_i32_0 = arith.constant 0 : i32
    %c0_i32_1 = arith.constant 0 : i32
    return %arg0, %c0_i32, %c0_i32_0 : i32, i32, i32
  }
  func.func @transform_2(%arg0: i32, %arg1: i32) -> (i32, i32) {
    %c0_i32 = arith.constant 0 : i32
    %c0_i32_0 = arith.constant 0 : i32
    %c0_i32_1 = arith.constant 0 : i32
    return %c0_i32, %c0_i32_0 : i32, i32
  }
  func.func @transform_3(%arg0: i32, %arg1: i32) -> (i32, i32) {
    %c0_i32 = arith.constant 0 : i32
    %c0_i32_0 = arith.constant 0 : i32
    %c0_i32_1 = arith.constant 0 : i32
    return %c0_i32, %c0_i32_0 : i32, i32
  }
  func.func @transform_4(%arg0: i32, %arg1: i32) -> (i32, i32) {
    %c0_i32 = arith.constant 0 : i32
    %c0_i32_0 = arith.constant 0 : i32
    %c0_i32_1 = arith.constant 0 : i32
    return %c0_i32, %c0_i32_0 : i32, i32
  }
  func.func @transform_5(%arg0: i32, %arg1: i32) -> (i32, i32) {
    %c0_i32 = arith.constant 0 : i32
    %c0_i32_0 = arith.constant 0 : i32
    %c0_i32_1 = arith.constant 0 : i32
    return %c0_i32, %c0_i32_0 : i32, i32
  }
  func.func @transform_6(%arg0: i32, %arg1: i32) -> (i32, i32) {
    %c0_i32 = arith.constant 0 : i32
    %c0_i32_0 = arith.constant 0 : i32
    %c0_i32_1 = arith.constant 0 : i32
    return %c0_i32, %c0_i32_0 : i32, i32
  }
  func.func @transform_7(%arg0: i32, %arg1: i32) -> (i32, i32) {
    %c0_i32 = arith.constant 0 : i32
    %c0_i32_0 = arith.constant 0 : i32
    %c0_i32_1 = arith.constant 0 : i32
    return %c0_i32, %c0_i32_0 : i32, i32
  }
  func.func @transform_8(%arg0: i32, %arg1: i32) -> (i32, i32) {
    %c0_i32 = arith.constant 0 : i32
    %c0_i32_0 = arith.constant 0 : i32
    %c0_i32_1 = arith.constant 0 : i32
    return %c0_i32, %c0_i32_0 : i32, i32
  }
  func.func @transform_9(%arg0: i32, %arg1: i32) -> (i32, i32) {
    %c0_i32 = arith.constant 0 : i32
    %c0_i32_0 = arith.constant 0 : i32
    %c0_i32_1 = arith.constant 0 : i32
    return %c0_i32, %c0_i32_0 : i32, i32
  }
  func.func @transform_10(%arg0: i32, %arg1: i32) -> (i32, i32) {
    %c0_i32 = arith.constant 0 : i32
    %c0_i32_0 = arith.constant 0 : i32
    %c0_i32_1 = arith.constant 0 : i32
    return %c0_i32, %c0_i32_0 : i32, i32
  }
  func.func @transform_11(%arg0: i32, %arg1: i32) -> (i32, i32) {
    %c0_i32 = arith.constant 0 : i32
    %c0_i32_0 = arith.constant 0 : i32
    %c0_i32_1 = arith.constant 0 : i32
    return %c0_i32, %c0_i32_0 : i32, i32
  }
  func.func @transform_12(%arg0: i32, %arg1: i32) -> (i32, i32) {
    %c0_i32 = arith.constant 0 : i32
    %c0_i32_0 = arith.constant 0 : i32
    %c0_i32_1 = arith.constant 0 : i32
    return %c0_i32, %c0_i32_0 : i32, i32
  }
  func.func @transform_13(%arg0: i32, %arg1: i32) -> (i32, i32) {
    %c0_i32 = arith.constant 0 : i32
    %c0_i32_0 = arith.constant 0 : i32
    %c0_i32_1 = arith.constant 0 : i32
    return %c0_i32, %c0_i32_0 : i32, i32
  }
  func.func @transform_14(%arg0: i32, %arg1: i32) -> (i32, i32) {
    %c0_i32 = arith.constant 0 : i32
    %c0_i32_0 = arith.constant 0 : i32
    %c0_i32_1 = arith.constant 0 : i32
    return %c0_i32, %c0_i32_0 : i32, i32
  }
  func.func @transform_15(%arg0: i32, %arg1: i32) -> (i32, i32) {
    %c0_i32 = arith.constant 0 : i32
    %c0_i32_0 = arith.constant 0 : i32
    %c0_i32_1 = arith.constant 0 : i32
    return %c0_i32, %c0_i32_0 : i32, i32
  }
  func.func @transform_16(%arg0: i32, %arg1: i32) -> (i32, i32) {
    %c0_i32 = arith.constant 0 : i32
    %c0_i32_0 = arith.constant 0 : i32
    %c0_i32_1 = arith.constant 0 : i32
    return %c0_i32, %c0_i32_0 : i32, i32
  }
  func.func @transform_17(%arg0: i32, %arg1: i32) -> (i32, i32) {
    %c0_i32 = arith.constant 0 : i32
    %c0_i32_0 = arith.constant 0 : i32
    %c0_i32_1 = arith.constant 0 : i32
    return %c0_i32, %c0_i32_0 : i32, i32
  }
  func.func @transform_18(%arg0: i32, %arg1: i32) -> (i32, i32) {
    %c0_i32 = arith.constant 0 : i32
    %c0_i32_0 = arith.constant 0 : i32
    %c0_i32_1 = arith.constant 0 : i32
    return %c0_i32, %c0_i32_0 : i32, i32
  }
  func.func @transform_19(%arg0: i32, %arg1: i32) -> (i32, i32) {
    %c0_i32 = arith.constant 0 : i32
    %c0_i32_0 = arith.constant 0 : i32
    %c0_i32_1 = arith.constant 0 : i32
    return %c0_i32, %c0_i32_0 : i32, i32
  }
  func.func @transform_20(%arg0: i32, %arg1: i32) -> (i32, i32, i32) {
    %c0_i32 = arith.constant 0 : i32
    %c0_i32_0 = arith.constant 0 : i32
    return %arg0, %arg1, %c0_i32 : i32, i32, i32
  }
}

module attributes {stable_mosaic.version = 11 : i64} {
  func.func @_encoder_heads_kernel(%arg0: i32, %arg1: i32, %arg2: memref<1x8x32xbf16, #tpu.memory_space<vmem>>, %arg3: memref<1x1x8xf32, #tpu.memory_space<vmem>>, %arg4: memref<32x32xbf16, #tpu.memory_space<vmem>>, %arg5: memref<32x32xbf16, #tpu.memory_space<vmem>>, %arg6: memref<32x32xbf16, #tpu.memory_space<vmem>>, %arg7: memref<32x32xbf16, #tpu.memory_space<vmem>>, %arg8: memref<1x32xf32, #tpu.memory_space<vmem>>, %arg9: memref<1x32xf32, #tpu.memory_space<vmem>>, %arg10: memref<1x32xf32, #tpu.memory_space<vmem>>, %arg11: memref<1x32xf32, #tpu.memory_space<vmem>>, %arg12: memref<32x128xbf16, #tpu.memory_space<vmem>>, %arg13: memref<1x128xf32, #tpu.memory_space<vmem>>, %arg14: memref<128x32xbf16, #tpu.memory_space<vmem>>, %arg15: memref<1x32xf32, #tpu.memory_space<vmem>>, %arg16: memref<1x32xf32, #tpu.memory_space<vmem>>, %arg17: memref<1x32xf32, #tpu.memory_space<vmem>>, %arg18: memref<1x32xf32, #tpu.memory_space<vmem>>, %arg19: memref<1x32xf32, #tpu.memory_space<vmem>>, %arg20: memref<32x128xbf16, #tpu.memory_space<vmem>>, %arg21: memref<1x128xf32, #tpu.memory_space<vmem>>, %arg22: memref<1x8x128xf32, #tpu.memory_space<vmem>>, %arg23: memref<8x32xbf16, #tpu.memory_space<vmem>>, %arg24: memref<8x32xbf16, #tpu.memory_space<vmem>>) attributes {dimension_semantics = [#tpu.dimension_semantics<parallel>, #tpu.dimension_semantics<arbitrary>], iteration_bounds = array<i64: 2, 1>, scalar_prefetch = 0 : i64, scratch_operands = 2 : i64, tpu.core_type = #tpu.core_type<tc>, window_params = [{transform_indices = @transform_0, window_bounds = array<i64: 1, 8, 32>}, {transform_indices = @transform_1, window_bounds = array<i64: 1, 1, 8>}, {pipeline_mode = #tpu.pipeline_mode<synchronous>, transform_indices = @transform_2, window_bounds = array<i64: 32, 32>}, {pipeline_mode = #tpu.pipeline_mode<synchronous>, transform_indices = @transform_3, window_bounds = array<i64: 32, 32>}, {pipeline_mode = #tpu.pipeline_mode<synchronous>, transform_indices = @transform_4, window_bounds = array<i64: 32, 32>}, {pipeline_mode = #tpu.pipeline_mode<synchronous>, transform_indices = @transform_5, window_bounds = array<i64: 32, 32>}, {pipeline_mode = #tpu.pipeline_mode<synchronous>, transform_indices = @transform_6, window_bounds = array<i64: 1, 32>}, {pipeline_mode = #tpu.pipeline_mode<synchronous>, transform_indices = @transform_7, window_bounds = array<i64: 1, 32>}, {pipeline_mode = #tpu.pipeline_mode<synchronous>, transform_indices = @transform_8, window_bounds = array<i64: 1, 32>}, {pipeline_mode = #tpu.pipeline_mode<synchronous>, transform_indices = @transform_9, window_bounds = array<i64: 1, 32>}, {pipeline_mode = #tpu.pipeline_mode<synchronous>, transform_indices = @transform_10, window_bounds = array<i64: 32, 128>}, {pipeline_mode = #tpu.pipeline_mode<synchronous>, transform_indices = @transform_11, window_bounds = array<i64: 1, 128>}, {pipeline_mode = #tpu.pipeline_mode<synchronous>, transform_indices = @transform_12, window_bounds = array<i64: 128, 32>}, {pipeline_mode = #tpu.pipeline_mode<synchronous>, transform_indices = @transform_13, window_bounds = array<i64: 1, 32>}, {pipeline_mode = #tpu.pipeline_mode<synchronous>, transform_indices = @transform_14, window_bounds = array<i64: 1, 32>}, {pipeline_mode = #tpu.pipeline_mode<synchronous>, transform_indices = @transform_15, window_bounds = array<i64: 1, 32>}, {pipeline_mode = #tpu.pipeline_mode<synchronous>, transform_indices = @transform_16, window_bounds = array<i64: 1, 32>}, {pipeline_mode = #tpu.pipeline_mode<synchronous>, transform_indices = @transform_17, window_bounds = array<i64: 1, 32>}, {pipeline_mode = #tpu.pipeline_mode<synchronous>, transform_indices = @transform_18, window_bounds = array<i64: 32, 128>}, {pipeline_mode = #tpu.pipeline_mode<synchronous>, transform_indices = @transform_19, window_bounds = array<i64: 1, 128>}, {transform_indices = @transform_20, window_bounds = array<i64: 1, 8, 128>}]} {
    %c0_i32 = arith.constant 0 : i32
    %0 = arith.cmpi eq, %arg1, %c0_i32 : i32
    %1 = arith.extui %0 : i1 to i32
    %c0_i32_0 = arith.constant 0 : i32
    %2 = arith.cmpi ne, %1, %c0_i32_0 : i32
    scf.if %2 {
      %c0_66 = arith.constant 0 : index
      %c0_67 = arith.constant 0 : index
      %c0_68 = arith.constant 0 : index
      %132 = vector.load %arg2[%c0_66, %c0_67, %c0_68] : memref<1x8x32xbf16, #tpu.memory_space<vmem>>, vector<1x8x32xbf16>
      %133 = vector.shape_cast %132 : vector<1x8x32xbf16> to vector<8x32xbf16>
      %c0_69 = arith.constant 0 : index
      %c0_70 = arith.constant 0 : index
      %134 = vector.load %arg5[%c0_69, %c0_70] : memref<32x32xbf16, #tpu.memory_space<vmem>>, vector<32x32xbf16>
      %cst_71 = arith.constant dense<0.000000e+00> : vector<8x32xf32>
      %135 = tpu.matmul %133, %134, %cst_71 {dimension_numbers = #tpu.dot_dimension_numbers<[1], [0], [0], [1], [0, 0, 1, 1], [], []>} : vector<8x32xbf16>, vector<32x32xbf16>, vector<8x32xf32> -> vector<8x32xf32>
      %c0_72 = arith.constant 0 : index
      %c0_73 = arith.constant 0 : index
      %136 = vector.load %arg9[%c0_72, %c0_73] : memref<1x32xf32, #tpu.memory_space<vmem>>, vector<1x32xf32>
      %137 = vector.broadcast %136 : vector<1x32xf32> to vector<8x32xf32>
      %138 = arith.addf %135, %137 : vector<8x32xf32>
      %c0_74 = arith.constant 0 : index
      %c0_75 = arith.constant 0 : index
      %139 = vector.load %arg6[%c0_74, %c0_75] : memref<32x32xbf16, #tpu.memory_space<vmem>>, vector<32x32xbf16>
      %cst_76 = arith.constant dense<0.000000e+00> : vector<8x32xf32>
      %140 = tpu.matmul %133, %139, %cst_76 {dimension_numbers = #tpu.dot_dimension_numbers<[1], [0], [0], [1], [0, 0, 1, 1], [], []>} : vector<8x32xbf16>, vector<32x32xbf16>, vector<8x32xf32> -> vector<8x32xf32>
      %c0_77 = arith.constant 0 : index
      %c0_78 = arith.constant 0 : index
      %141 = vector.load %arg10[%c0_77, %c0_78] : memref<1x32xf32, #tpu.memory_space<vmem>>, vector<1x32xf32>
      %142 = vector.broadcast %141 : vector<1x32xf32> to vector<8x32xf32>
      %143 = arith.addf %140, %142 : vector<8x32xf32>
      %144 = arith.truncf %138 : vector<8x32xf32> to vector<8x32xbf16>
      %c0_79 = arith.constant 0 : index
      %c0_80 = arith.constant 0 : index
      %145 = vector.load %arg23[%c0_79, %c0_80] : memref<8x32xbf16, #tpu.memory_space<vmem>>, vector<8x32xbf16>
      tpu.vector_store %arg23[%c0_79, %c0_80], %144 {strides = array<i32>} : memref<8x32xbf16, #tpu.memory_space<vmem>>, vector<8x32xbf16>,
      %146 = arith.truncf %143 : vector<8x32xf32> to vector<8x32xbf16>
      %c0_81 = arith.constant 0 : index
      %c0_82 = arith.constant 0 : index
      %147 = vector.load %arg24[%c0_81, %c0_82] : memref<8x32xbf16, #tpu.memory_space<vmem>>, vector<8x32xbf16>
      tpu.vector_store %arg24[%c0_81, %c0_82], %146 {strides = array<i32>} : memref<8x32xbf16, #tpu.memory_space<vmem>>, vector<8x32xbf16>,
    } else {
    }
    %c8_i32 = arith.constant 8 : i32
    %3 = arith.muli %arg1, %c8_i32 : i32
    %4 = tpu.assume_multiple %3, 8 : i32
    %c0 = arith.constant 0 : index
    %5 = arith.index_cast %4 : i32 to index
    %c0_1 = arith.constant 0 : index
    %6 = vector.load %arg2[%c0, %5, %c0_1] : memref<1x8x32xbf16, #tpu.memory_space<vmem>>, vector<1x8x32xbf16>
    %7 = vector.shape_cast %6 : vector<1x8x32xbf16> to vector<8x32xbf16>
    %c0_2 = arith.constant 0 : index
    %c0_3 = arith.constant 0 : index
    %c0_4 = arith.constant 0 : index
    %8 = vector.load %arg3[%c0_2, %c0_3, %c0_4] : memref<1x1x8xf32, #tpu.memory_space<vmem>>, vector<1x1x8xf32>
    %9 = vector.shape_cast %8 : vector<1x1x8xf32> to vector<1x8xf32>
    %cst = arith.constant 3.200000e+01 : f32
    %10 = math.sqrt %cst : f32
    %cst_5 = arith.constant 1.000000e+00 : f32
    %11 = arith.divf %cst_5, %10 : f32
    %cst_6 = arith.constant 1.000000e+00 : f32
    %12 = vector.broadcast %cst_6 : f32 to vector<1x8xf32>
    %13 = arith.subf %12, %9 : vector<1x8xf32>
    %cst_7 = arith.constant -1.000000e+09 : f32
    %14 = vector.broadcast %cst_7 : f32 to vector<1x8xf32>
    %15 = arith.mulf %13, %14 : vector<1x8xf32>
    %c0_8 = arith.constant 0 : index
    %c0_9 = arith.constant 0 : index
    %16 = vector.load %arg4[%c0_8, %c0_9] : memref<32x32xbf16, #tpu.memory_space<vmem>>, vector<32x32xbf16>
    %cst_10 = arith.constant dense<0.000000e+00> : vector<8x32xf32>
    %17 = tpu.matmul %7, %16, %cst_10 {dimension_numbers = #tpu.dot_dimension_numbers<[1], [0], [0], [1], [0, 0, 1, 1], [], []>} : vector<8x32xbf16>, vector<32x32xbf16>, vector<8x32xf32> -> vector<8x32xf32>
    %c0_11 = arith.constant 0 : index
    %c0_12 = arith.constant 0 : index
    %18 = vector.load %arg8[%c0_11, %c0_12] : memref<1x32xf32, #tpu.memory_space<vmem>>, vector<1x32xf32>
    %19 = vector.broadcast %18 : vector<1x32xf32> to vector<8x32xf32>
    %20 = arith.addf %17, %19 : vector<8x32xf32>
    %21 = arith.truncf %20 : vector<8x32xf32> to vector<8x32xbf16>
    %c0_13 = arith.constant 0 : index
    %c0_14 = arith.constant 0 : index
    %22 = vector.load %arg23[%c0_13, %c0_14] : memref<8x32xbf16, #tpu.memory_space<vmem>>, vector<8x32xbf16>
    %cst_15 = arith.constant dense<0.000000e+00> : vector<8x8xf32>
    %23 = tpu.matmul %21, %22, %cst_15 {dimension_numbers = #tpu.dot_dimension_numbers<[1], [1], [0], [0], [0, 0, 1, 0], [], []>} : vector<8x32xbf16>, vector<8x32xbf16>, vector<8x8xf32> -> vector<8x8xf32>
    %24 = vector.broadcast %11 : f32 to vector<8x8xf32>
    %25 = arith.mulf %23, %24 : vector<8x8xf32>
    %26 = vector.broadcast %15 : vector<1x8xf32> to vector<8x8xf32>
    %27 = arith.addf %25, %26 : vector<8x8xf32>
    %cst_16 = arith.constant dense<0xFF800000> : vector<8xf32>
    %28 = vector.multi_reduction <maximumf>, %27, %cst_16 [1] : vector<8x8xf32> to vector<8xf32>
    %29 = vector.shape_cast %28 : vector<8xf32> to vector<8x1xf32>
    %30 = vector.broadcast %29 : vector<8x1xf32> to vector<8x8xf32>
    %31 = arith.subf %27, %30 : vector<8x8xf32>
    %32 = math.exp %31 : vector<8x8xf32>
    %cst_17 = arith.constant dense<0.000000e+00> : vector<8xf32>
    %33 = vector.multi_reduction <add>, %32, %cst_17 [1] : vector<8x8xf32> to vector<8xf32>
    %34 = vector.shape_cast %33 : vector<8xf32> to vector<8x1xf32>
    %35 = tpu.reciprocal %34 {approx = true} : vector<8x1xf32> -> vector<8x1xf32>
    %36 = vector.broadcast %35 : vector<8x1xf32> to vector<8x8xf32>
    %37 = arith.mulf %32, %36 : vector<8x8xf32>
    %38 = arith.truncf %37 : vector<8x8xf32> to vector<8x8xbf16>
    %c0_18 = arith.constant 0 : index
    %c0_19 = arith.constant 0 : index
    %39 = vector.load %arg24[%c0_18, %c0_19] : memref<8x32xbf16, #tpu.memory_space<vmem>>, vector<8x32xbf16>
    %cst_20 = arith.constant dense<0.000000e+00> : vector<8x32xf32>
    %40 = tpu.matmul %38, %39, %cst_20 {dimension_numbers = #tpu.dot_dimension_numbers<[1], [0], [0], [1], [0, 0, 1, 1], [], []>} : vector<8x8xbf16>, vector<8x32xbf16>, vector<8x32xf32> -> vector<8x32xf32>
    %41 = arith.truncf %40 : vector<8x32xf32> to vector<8x32xbf16>
    %c0_21 = arith.constant 0 : index
    %c0_22 = arith.constant 0 : index
    %42 = vector.load %arg7[%c0_21, %c0_22] : memref<32x32xbf16, #tpu.memory_space<vmem>>, vector<32x32xbf16>
    %cst_23 = arith.constant dense<0.000000e+00> : vector<8x32xf32>
    %43 = tpu.matmul %41, %42, %cst_23 {dimension_numbers = #tpu.dot_dimension_numbers<[1], [0], [0], [1], [0, 0, 1, 1], [], []>} : vector<8x32xbf16>, vector<32x32xbf16>, vector<8x32xf32> -> vector<8x32xf32>
    %c0_24 = arith.constant 0 : index
    %c0_25 = arith.constant 0 : index
    %44 = vector.load %arg11[%c0_24, %c0_25] : memref<1x32xf32, #tpu.memory_space<vmem>>, vector<1x32xf32>
    %45 = vector.broadcast %44 : vector<1x32xf32> to vector<8x32xf32>
    %46 = arith.addf %43, %45 : vector<8x32xf32>
    %47 = arith.extf %7 : vector<8x32xbf16> to vector<8x32xf32>
    %48 = arith.addf %47, %46 : vector<8x32xf32>
    %cst_26 = arith.constant dense<0.000000e+00> : vector<8xf32>
    %49 = vector.multi_reduction <add>, %48, %cst_26 [1] : vector<8x32xf32> to vector<8xf32>
    %50 = vector.shape_cast %49 : vector<8xf32> to vector<8x1xf32>
    %cst_27 = arith.constant 3.200000e+01 : f32
    %51 = vector.broadcast %cst_27 : f32 to vector<8x1xf32>
    %52 = arith.divf %50, %51 : vector<8x1xf32>
    %53 = vector.broadcast %52 : vector<8x1xf32> to vector<8x32xf32>
    %54 = arith.subf %48, %53 : vector<8x32xf32>
    %55 = arith.mulf %54, %54 : vector<8x32xf32>
    %cst_28 = arith.constant dense<0.000000e+00> : vector<8xf32>
    %56 = vector.multi_reduction <add>, %55, %cst_28 [1] : vector<8x32xf32> to vector<8xf32>
    %57 = vector.shape_cast %56 : vector<8xf32> to vector<8x1xf32>
    %cst_29 = arith.constant 3.200000e+01 : f32
    %58 = vector.broadcast %cst_29 : f32 to vector<8x1xf32>
    %59 = arith.divf %57, %58 : vector<8x1xf32>
    %60 = vector.broadcast %52 : vector<8x1xf32> to vector<8x32xf32>
    %61 = arith.subf %48, %60 : vector<8x32xf32>
    %cst_30 = arith.constant 9.99999996E-13 : f32
    %62 = vector.broadcast %cst_30 : f32 to vector<8x1xf32>
    %63 = arith.addf %59, %62 : vector<8x1xf32>
    %64 = math.rsqrt %63 : vector<8x1xf32>
    %65 = vector.broadcast %64 : vector<8x1xf32> to vector<8x32xf32>
    %66 = arith.mulf %61, %65 : vector<8x32xf32>
    %c0_31 = arith.constant 0 : index
    %c0_32 = arith.constant 0 : index
    %67 = vector.load %arg16[%c0_31, %c0_32] : memref<1x32xf32, #tpu.memory_space<vmem>>, vector<1x32xf32>
    %68 = vector.broadcast %67 : vector<1x32xf32> to vector<8x32xf32>
    %69 = arith.mulf %66, %68 : vector<8x32xf32>
    %c0_33 = arith.constant 0 : index
    %c0_34 = arith.constant 0 : index
    %70 = vector.load %arg17[%c0_33, %c0_34] : memref<1x32xf32, #tpu.memory_space<vmem>>, vector<1x32xf32>
    %71 = vector.broadcast %70 : vector<1x32xf32> to vector<8x32xf32>
    %72 = arith.addf %69, %71 : vector<8x32xf32>
    %73 = arith.truncf %72 : vector<8x32xf32> to vector<8x32xbf16>
    %c0_35 = arith.constant 0 : index
    %c0_36 = arith.constant 0 : index
    %74 = vector.load %arg12[%c0_35, %c0_36] : memref<32x128xbf16, #tpu.memory_space<vmem>>, vector<32x128xbf16>
    %cst_37 = arith.constant dense<0.000000e+00> : vector<8x128xf32>
    %75 = tpu.matmul %73, %74, %cst_37 {dimension_numbers = #tpu.dot_dimension_numbers<[1], [0], [0], [1], [0, 0, 1, 1], [], []>} : vector<8x32xbf16>, vector<32x128xbf16>, vector<8x128xf32> -> vector<8x128xf32>
    %c0_38 = arith.constant 0 : index
    %c0_39 = arith.constant 0 : index
    %76 = vector.load %arg13[%c0_38, %c0_39] : memref<1x128xf32, #tpu.memory_space<vmem>>, vector<1x128xf32>
    %77 = vector.broadcast %76 : vector<1x128xf32> to vector<8x128xf32>
    %78 = arith.addf %75, %77 : vector<8x128xf32>
    %79 = arith.mulf %78, %78 : vector<8x128xf32>
    %80 = arith.mulf %78, %79 : vector<8x128xf32>
    %cst_40 = arith.constant 4.471500e-02 : f32
    %81 = vector.broadcast %cst_40 : f32 to vector<8x128xf32>
    %82 = arith.mulf %81, %80 : vector<8x128xf32>
    %83 = arith.addf %78, %82 : vector<8x128xf32>
    %cst_41 = arith.constant 0.797884583 : f32
    %84 = vector.broadcast %cst_41 : f32 to vector<8x128xf32>
    %85 = arith.mulf %84, %83 : vector<8x128xf32>
    %86 = math.tanh %85 : vector<8x128xf32>
    %cst_42 = arith.constant 1.000000e+00 : f32
    %87 = vector.broadcast %cst_42 : f32 to vector<8x128xf32>
    %88 = arith.addf %87, %86 : vector<8x128xf32>
    %cst_43 = arith.constant 5.000000e-01 : f32
    %89 = vector.broadcast %cst_43 : f32 to vector<8x128xf32>
    %90 = arith.mulf %89, %88 : vector<8x128xf32>
    %91 = arith.mulf %78, %90 : vector<8x128xf32>
    %92 = arith.truncf %91 : vector<8x128xf32> to vector<8x128xbf16>
    %c0_44 = arith.constant 0 : index
    %c0_45 = arith.constant 0 : index
    %93 = vector.load %arg14[%c0_44, %c0_45] : memref<128x32xbf16, #tpu.memory_space<vmem>>, vector<128x32xbf16>
    %cst_46 = arith.constant dense<0.000000e+00> : vector<8x32xf32>
    %94 = tpu.matmul %92, %93, %cst_46 {dimension_numbers = #tpu.dot_dimension_numbers<[1], [0], [0], [1], [0, 0, 1, 1], [], []>} : vector<8x128xbf16>, vector<128x32xbf16>, vector<8x32xf32> -> vector<8x32xf32>
    %c0_47 = arith.constant 0 : index
    %c0_48 = arith.constant 0 : index
    %95 = vector.load %arg15[%c0_47, %c0_48] : memref<1x32xf32, #tpu.memory_space<vmem>>, vector<1x32xf32>
    %96 = vector.broadcast %95 : vector<1x32xf32> to vector<8x32xf32>
    %97 = arith.addf %94, %96 : vector<8x32xf32>
    %98 = arith.addf %72, %97 : vector<8x32xf32>
    %cst_49 = arith.constant dense<0.000000e+00> : vector<8xf32>
    %99 = vector.multi_reduction <add>, %98, %cst_49 [1] : vector<8x32xf32> to vector<8xf32>
    %100 = vector.shape_cast %99 : vector<8xf32> to vector<8x1xf32>
    %cst_50 = arith.constant 3.200000e+01 : f32
    %101 = vector.broadcast %cst_50 : f32 to vector<8x1xf32>
    %102 = arith.divf %100, %101 : vector<8x1xf32>
    %103 = vector.broadcast %102 : vector<8x1xf32> to vector<8x32xf32>
    %104 = arith.subf %98, %103 : vector<8x32xf32>
    %105 = arith.mulf %104, %104 : vector<8x32xf32>
    %cst_51 = arith.constant dense<0.000000e+00> : vector<8xf32>
    %106 = vector.multi_reduction <add>, %105, %cst_51 [1] : vector<8x32xf32> to vector<8xf32>
    %107 = vector.shape_cast %106 : vector<8xf32> to vector<8x1xf32>
    %cst_52 = arith.constant 3.200000e+01 : f32
    %108 = vector.broadcast %cst_52 : f32 to vector<8x1xf32>
    %109 = arith.divf %107, %108 : vector<8x1xf32>
    %110 = vector.broadcast %102 : vector<8x1xf32> to vector<8x32xf32>
    %111 = arith.subf %98, %110 : vector<8x32xf32>
    %cst_53 = arith.constant 9.99999996E-13 : f32
    %112 = vector.broadcast %cst_53 : f32 to vector<8x1xf32>
    %113 = arith.addf %109, %112 : vector<8x1xf32>
    %114 = math.rsqrt %113 : vector<8x1xf32>
    %115 = vector.broadcast %114 : vector<8x1xf32> to vector<8x32xf32>
    %116 = arith.mulf %111, %115 : vector<8x32xf32>
    %c0_54 = arith.constant 0 : index
    %c0_55 = arith.constant 0 : index
    %117 = vector.load %arg18[%c0_54, %c0_55] : memref<1x32xf32, #tpu.memory_space<vmem>>, vector<1x32xf32>
    %118 = vector.broadcast %117 : vector<1x32xf32> to vector<8x32xf32>
    %119 = arith.mulf %116, %118 : vector<8x32xf32>
    %c0_56 = arith.constant 0 : index
    %c0_57 = arith.constant 0 : index
    %120 = vector.load %arg19[%c0_56, %c0_57] : memref<1x32xf32, #tpu.memory_space<vmem>>, vector<1x32xf32>
    %121 = vector.broadcast %120 : vector<1x32xf32> to vector<8x32xf32>
    %122 = arith.addf %119, %121 : vector<8x32xf32>
    %123 = arith.truncf %122 : vector<8x32xf32> to vector<8x32xbf16>
    %c0_58 = arith.constant 0 : index
    %c0_59 = arith.constant 0 : index
    %124 = vector.load %arg20[%c0_58, %c0_59] : memref<32x128xbf16, #tpu.memory_space<vmem>>, vector<32x128xbf16>
    %cst_60 = arith.constant dense<0.000000e+00> : vector<8x128xf32>
    %125 = tpu.matmul %123, %124, %cst_60 {dimension_numbers = #tpu.dot_dimension_numbers<[1], [0], [0], [1], [0, 0, 1, 1], [], []>} : vector<8x32xbf16>, vector<32x128xbf16>, vector<8x128xf32> -> vector<8x128xf32>
    %c0_61 = arith.constant 0 : index
    %c0_62 = arith.constant 0 : index
    %126 = vector.load %arg21[%c0_61, %c0_62] : memref<1x128xf32, #tpu.memory_space<vmem>>, vector<1x128xf32>
    %127 = vector.broadcast %126 : vector<1x128xf32> to vector<8x128xf32>
    %128 = arith.addf %125, %127 : vector<8x128xf32>
    %c0_63 = arith.constant 0 : index
    %c0_64 = arith.constant 0 : index
    %c0_65 = arith.constant 0 : index
    %129 = vector.load %arg22[%c0_63, %c0_64, %c0_65] : memref<1x8x128xf32, #tpu.memory_space<vmem>>, vector<1x8x128xf32>
    %130 = vector.shape_cast %129 : vector<1x8x128xf32> to vector<8x128xf32>
    %131 = vector.shape_cast %128 : vector<8x128xf32> to vector<1x8x128xf32>
    tpu.vector_store %arg22[%c0_63, %c0_64, %c0_65], %131 {strides = array<i32>} : memref<1x8x128xf32, #tpu.memory_space<vmem>>, vector<1x8x128xf32>,
    return
  }
  func.func @transform_0(%arg0: i32, %arg1: i32) -> (i32, i32, i32) {
    %c0_i32 = arith.constant 0 : i32
    %c0_i32_0 = arith.constant 0 : i32
    %c0_i32_1 = arith.constant 0 : i32
    return %arg0, %c0_i32, %c0_i32_0 : i32, i32, i32
  }
  func.func @transform_1(%arg0: i32, %arg1: i32) -> (i32, i32, i32) {
    %c0_i32 = arith.constant 0 : i32
    %c0_i32_0 = arith.constant 0 : i32
    %c0_i32_1 = arith.constant 0 : i32
    return %arg0, %c0_i32, %c0_i32_0 : i32, i32, i32
  }
  func.func @transform_2(%arg0: i32, %arg1: i32) -> (i32, i32) {
    %c0_i32 = arith.constant 0 : i32
    %c0_i32_0 = arith.constant 0 : i32
    %c0_i32_1 = arith.constant 0 : i32
    return %c0_i32, %c0_i32_0 : i32, i32
  }
  func.func @transform_3(%arg0: i32, %arg1: i32) -> (i32, i32) {
    %c0_i32 = arith.constant 0 : i32
    %c0_i32_0 = arith.constant 0 : i32
    %c0_i32_1 = arith.constant 0 : i32
    return %c0_i32, %c0_i32_0 : i32, i32
  }
  func.func @transform_4(%arg0: i32, %arg1: i32) -> (i32, i32) {
    %c0_i32 = arith.constant 0 : i32
    %c0_i32_0 = arith.constant 0 : i32
    %c0_i32_1 = arith.constant 0 : i32
    return %c0_i32, %c0_i32_0 : i32, i32
  }
  func.func @transform_5(%arg0: i32, %arg1: i32) -> (i32, i32) {
    %c0_i32 = arith.constant 0 : i32
    %c0_i32_0 = arith.constant 0 : i32
    %c0_i32_1 = arith.constant 0 : i32
    return %c0_i32, %c0_i32_0 : i32, i32
  }
  func.func @transform_6(%arg0: i32, %arg1: i32) -> (i32, i32) {
    %c0_i32 = arith.constant 0 : i32
    %c0_i32_0 = arith.constant 0 : i32
    %c0_i32_1 = arith.constant 0 : i32
    return %c0_i32, %c0_i32_0 : i32, i32
  }
  func.func @transform_7(%arg0: i32, %arg1: i32) -> (i32, i32) {
    %c0_i32 = arith.constant 0 : i32
    %c0_i32_0 = arith.constant 0 : i32
    %c0_i32_1 = arith.constant 0 : i32
    return %c0_i32, %c0_i32_0 : i32, i32
  }
  func.func @transform_8(%arg0: i32, %arg1: i32) -> (i32, i32) {
    %c0_i32 = arith.constant 0 : i32
    %c0_i32_0 = arith.constant 0 : i32
    %c0_i32_1 = arith.constant 0 : i32
    return %c0_i32, %c0_i32_0 : i32, i32
  }
  func.func @transform_9(%arg0: i32, %arg1: i32) -> (i32, i32) {
    %c0_i32 = arith.constant 0 : i32
    %c0_i32_0 = arith.constant 0 : i32
    %c0_i32_1 = arith.constant 0 : i32
    return %c0_i32, %c0_i32_0 : i32, i32
  }
  func.func @transform_10(%arg0: i32, %arg1: i32) -> (i32, i32) {
    %c0_i32 = arith.constant 0 : i32
    %c0_i32_0 = arith.constant 0 : i32
    %c0_i32_1 = arith.constant 0 : i32
    return %c0_i32, %c0_i32_0 : i32, i32
  }
  func.func @transform_11(%arg0: i32, %arg1: i32) -> (i32, i32) {
    %c0_i32 = arith.constant 0 : i32
    %c0_i32_0 = arith.constant 0 : i32
    %c0_i32_1 = arith.constant 0 : i32
    return %c0_i32, %c0_i32_0 : i32, i32
  }
  func.func @transform_12(%arg0: i32, %arg1: i32) -> (i32, i32) {
    %c0_i32 = arith.constant 0 : i32
    %c0_i32_0 = arith.constant 0 : i32
    %c0_i32_1 = arith.constant 0 : i32
    return %c0_i32, %c0_i32_0 : i32, i32
  }
  func.func @transform_13(%arg0: i32, %arg1: i32) -> (i32, i32) {
    %c0_i32 = arith.constant 0 : i32
    %c0_i32_0 = arith.constant 0 : i32
    %c0_i32_1 = arith.constant 0 : i32
    return %c0_i32, %c0_i32_0 : i32, i32
  }
  func.func @transform_14(%arg0: i32, %arg1: i32) -> (i32, i32) {
    %c0_i32 = arith.constant 0 : i32
    %c0_i32_0 = arith.constant 0 : i32
    %c0_i32_1 = arith.constant 0 : i32
    return %c0_i32, %c0_i32_0 : i32, i32
  }
  func.func @transform_15(%arg0: i32, %arg1: i32) -> (i32, i32) {
    %c0_i32 = arith.constant 0 : i32
    %c0_i32_0 = arith.constant 0 : i32
    %c0_i32_1 = arith.constant 0 : i32
    return %c0_i32, %c0_i32_0 : i32, i32
  }
  func.func @transform_16(%arg0: i32, %arg1: i32) -> (i32, i32) {
    %c0_i32 = arith.constant 0 : i32
    %c0_i32_0 = arith.constant 0 : i32
    %c0_i32_1 = arith.constant 0 : i32
    return %c0_i32, %c0_i32_0 : i32, i32
  }
  func.func @transform_17(%arg0: i32, %arg1: i32) -> (i32, i32) {
    %c0_i32 = arith.constant 0 : i32
    %c0_i32_0 = arith.constant 0 : i32
    %c0_i32_1 = arith.constant 0 : i32
    return %c0_i32, %c0_i32_0 : i32, i32
  }
  func.func @transform_18(%arg0: i32, %arg1: i32) -> (i32, i32) {
    %c0_i32 = arith.constant 0 : i32
    %c0_i32_0 = arith.constant 0 : i32
    %c0_i32_1 = arith.constant 0 : i32
    return %c0_i32, %c0_i32_0 : i32, i32
  }
  func.func @transform_19(%arg0: i32, %arg1: i32) -> (i32, i32) {
    %c0_i32 = arith.constant 0 : i32
    %c0_i32_0 = arith.constant 0 : i32
    %c0_i32_1 = arith.constant 0 : i32
    return %c0_i32, %c0_i32_0 : i32, i32
  }
  func.func @transform_20(%arg0: i32, %arg1: i32) -> (i32, i32, i32) {
    %c0_i32 = arith.constant 0 : i32
    %c0_i32_0 = arith.constant 0 : i32
    return %arg0, %arg1, %c0_i32 : i32, i32, i32
  }
}

</mosaic_0001>

<bundles_post_ra>
// kernel: tpu_custom_call.1
= control target key start
LH: loop header
LB: loop body
LE: loop exit
PB: predicated region body
PF: predicated region fallthrough
CT: control target
= control target key end

     0   :  { %s2756_s0 = inlined_call_operand.hbm [shape: bf16[2,8,32], index: 0, kind: input, shape index: {}]   ;;  %s2757_s1 = inlined_call_operand.hbm [shape: f32[2,1,8], index: 1, kind: input, shape index: {}]   ;;  %s2758_s2 = inlined_call_operand.vmem [shape: bf16[32,32], index: 2, kind: input, shape index: {}]   ;;  %s2759_s3 = inlined_call_operand.vmem [shape: bf16[32,32], index: 3, kind: input, shape index: {}]   ;;  %s2760_s4 = inlined_call_operand.vmem [shape: bf16[32,32], index: 4, kind: input, shape index: {}]   ;;  %s2761_s5 = inlined_call_operand.vmem [shape: bf16[32,32], index: 5, kind: input, shape index: {}]   ;;  %s2762_s6 = inlined_call_operand.vmem [shape: f32[1,32], index: 6, kind: input, shape index: {}]   ;;  %s2763_s7 = inlined_call_operand.hbm [shape: f32[1,32], index: 7, kind: input, shape index: {}]   ;;  %s2764_s8 = inlined_call_operand.hbm [shape: f32[1,32], index: 8, kind: input, shape index: {}]   ;;  %s2765_s9 = inlined_call_operand.hbm [shape: f32[1,32], index: 9, kind: input, shape index: {}]   ;;  %s2766_s10 = inlined_call_operand.vmem [shape: bf16[32,128], index: 10, kind: input, shape index: {}]   ;;  %s2767_s11 = inlined_call_operand.hbm [shape: f32[1,128], index: 11, kind: input, shape index: {}]   ;;  %s2768_s12 = inlined_call_operand.vmem [shape: bf16[128,32], index: 12, kind: input, shape index: {}]   ;;  %s2769_s13 = inlined_call_operand.hbm [shape: f32[1,32], index: 13, kind: input, shape index: {}]   ;;  %s2770_s14 = inlined_call_operand.hbm [shape: f32[1,32], index: 14, kind: input, shape index: {}]   ;;  %s2771_s15 = inlined_call_operand.hbm [shape: f32[1,32], index: 15, kind: input, shape index: {}]   ;;  %s2772_s16 = inlined_call_operand.hbm [shape: f32[1,32], index: 16, kind: input, shape index: {}]   ;;  %s2773_s17 = inlined_call_operand.hbm [shape: f32[1,32], index: 17, kind: input, shape index: {}]   ;;  %s2774_s18 = inlined_call_operand.vmem [shape: bf16[32,128], index: 18, kind: input, shape index: {}]   ;;  %s2775_s19 = inlined_call_operand.hbm [shape: f32[1,128], index: 19, kind: input, shape index: {}]   ;;  %s2776_s20 = inlined_call_operand.hbm [shape: f32[2,8,128], index: 20, kind: output, shape index: {}]  }
   0x1   :  { %2786 = sst [smem:[#allocation38_spill]] %s2756_s0 }
   0x2   :  { %2787 = sst [smem:[#allocation39_spill]] %s2757_s1 }
   0x3   :  { %2788 = sst [smem:[#allocation40_spill]] %s2758_s2 }
   0x4   :  { %2789 = sst [smem:[#allocation41_spill]] %s2759_s3 }
   0x5   :  { %2790 = sst [smem:[#allocation42_spill]] %s2760_s4 }
   0x6   :  { %2791 = sst [smem:[#allocation43_spill]] %s2763_s7 }
   0x7   :  { %2792 = sst [smem:[#allocation44_spill]] %s2764_s8 }
   0x8   :  { %2793 = sst [smem:[#allocation45_spill]] %s2765_s9 }
   0x9   :  { %2794 = sst [smem:[#allocation46_spill]] %s2766_s10 }
   0xa   :  { %2795 = sst [smem:[#allocation47_spill]] %s2767_s11 }
   0xb   :  { %2796 = sst [smem:[#allocation48_spill]] %s2768_s12 }
   0xc   :  { %2797 = sst [smem:[#allocation49_spill]] %s2769_s13 }
   0xd   :  { %2798 = sst [smem:[#allocation50_spill]] %s2770_s14 }
   0xe   :  { %2799 = sst [smem:[#allocation51_spill]] %s2771_s15 }
   0xf   :  { %2800 = sst [smem:[#allocation52_spill]] %s2772_s16 }
  0x10   :  { %2801 = sst [smem:[#allocation53_spill]] %s2773_s17 }
  0x11   :  { %2802 = sst [smem:[#allocation54_spill]] %s2774_s18 }
  0x12   :  { %2803 = sst [smem:[#allocation55_spill]] %s2775_s19 }
  0x13   :  { %2804 = sst [smem:[#allocation56_spill]] %s2776_s20 }
  0x14   :  { %25 = vsyncpa [#allocation5], 0 }
  0x15   :  { %27 = vsyncpa [#allocation5 + $0x1], 0 }
  0x16   :  { %28 = vsyncpa [#allocation8], 0 }
  0x17   :  { %30 = vsyncpa [#allocation8 + $0x1], 0 }
  0x18   :  { %31 = vsyncpa [#allocation11], 0 }
  0x19   :  { %32 = vsyncpa [#allocation14], 0 }
  0x1a   :  { %33 = vsyncpa [#allocation17], 0 }
  0x1b   :  { %34 = vsyncpa [#allocation20], 0 }
  0x1c   :  { %35 = vsyncpa [#allocation23], 0 }
  0x1d   :  { %36 = vsyncpa [#allocation6], 0 }
  0x1e   :  { %38 = vsyncpa [#allocation6 + $0x1], 0  ;;  %s2438_s1 = smov 0   ;;  %s2440_s22 = smov 0  }
  0x1f   :  { %s2442_s23 = smov 0   ;;  %s2444_s24 = smov 0  }
  0x20   :  { %s2446_s2 = smov 0   ;;  %s2448_s25 = smov 0  }
  0x21 LB: > { %2805 = sst [smem:[#allocation34_spill]] %s2308_s23  ;;  %s2469_s3 = sadd.s32 4294967295, %s2320_s25   ;;  %s2320_s25 = sphi %s2448_s25, %s44_s25   ;;  %s2316_s2 = sphi %s2446_s2, %s2842_s2   ;;  %s2312_s24 = sphi %s2444_s24, %s2841_s24   ;;  %s2308_s23 = sphi %s2442_s23, %s2837_s23   ;;  %s2304_s22 = sphi %s2440_s22, %s2840_s22   ;;  %s2300_s1 = sphi %s2438_s1, %s2839_s1  }
  0x22   : > { %2806 = sst [smem:[#allocation35_spill]] %s2312_s24  ;;  %p1519_p0 = scmp.ge.s32.totalorder %s2320_s25, 1 }
  0x23   : > { %p77_p1 = scmp.eq.s32.totalorder %s2469_s3, 0  ;;  %p519_p2 = scmp.lt.s32.totalorder %s2320_s25, 3 }
  0x24   : > { %s2807_s7 = sld [smem:[#allocation43_spill]]  ;;  %p1530_p4 = scmp.ge.s32.totalorder %s2320_s25, 2 }
  0x25   : > { %p2477_p3 = pnand %p1519_p0, %p519_p2  ;;  %s2322_s29 = smov [#allocation9]  }
  0x26   : > { %s548_s30 = sshll.u32 %s2322_s29, 4  ;;  %s2809_s8 = sld [smem:[#allocation44_spill]]  ;;  %s549_s30 = int_to_ptr.vmem [resolvable:$true] %s548_s30 }
  0x27   : > { %p1704_p5 = pneg %p2477_p3  ;;  %s2811_s11 = sld [smem:[#allocation47_spill]] }
  0x28   : > { %s2323_s18 = smov [#allocation10]   ;;  %s2812_s14 = sld [smem:[#allocation50_spill]] }
  0x29   : > { %p2489_p6 = pnand %p1704_p5, %p77_p1  ;;  %s560_s29 = sshll.u32 %s2323_s18, 4  ;;  %s561_s29 = int_to_ptr.vmem [resolvable:$true] %s560_s29 }
  0x2a   : > { %s546_s28 = sshll.u32 %s2807_s7, 4  ;;  %s2324_s12 = smov [#allocation13]   ;;  %s547_s28 = int_to_ptr.hbm [resolvable:$true] %s546_s28 }
  0x2b   : > { %1707 = dma.hbm_to_vmem [thread:$0]  (!%p2489_p6), %s547_s28, 16, %s549_s30, [#allocation8]  }
  0x2c   : > { %s558_s20 = sshll.u32 %s2809_s8, 4  ;;  %s587_s10 = sshll.u32 %s2324_s12, 4  ;;  %s559_s20 = int_to_ptr.hbm [resolvable:$true] %s558_s20  ;;  %s588_s10 = int_to_ptr.vmem [resolvable:$true] %s587_s10 }
  0x2d   : > { %s585_s24 = sshll.u32 %s2811_s11, 4  ;;  %s2325_s7 = smov [#allocation16]   ;;  %s586_s24 = int_to_ptr.hbm [resolvable:$true] %s585_s24 }
  0x2e   : > { %1710 = dma.hbm_to_vmem [thread:$0]  (!%p2489_p6), %s559_s20, 16, %s561_s29, [#allocation11]  }
  0x2f   : > { %s612_s8 = sshll.u32 %s2812_s14, 4  ;;  %s614_s18 = sshll.u32 %s2325_s7, 4  ;;  %s613_s8 = int_to_ptr.hbm [resolvable:$true] %s612_s8  ;;  %s615_s18 = int_to_ptr.vmem [resolvable:$true] %s614_s18 }
  0x30   : > { %1716 = dma.hbm_to_vmem [thread:$0]  (!%p2489_p6), %s586_s24, 16, %s588_s10, [#allocation14]  }
  0x31   : > { %s2813_s16 = sld [smem:[#allocation52_spill]]  ;;  %s2326_s12 = smov [#allocation19]  }
  0x32   : > { %1722 = dma.hbm_to_vmem [thread:$0]  (!%p2489_p6), %s613_s8, 16, %s615_s18, [#allocation17]  }
  0x33   : > { %s2814_s9 = sld [smem:[#allocation45_spill]]  ;;  %s638_s0 = sshll.u32 %s2326_s12, 4  ;;  %s639_s0 = int_to_ptr.vmem [resolvable:$true] %s638_s0 }
  0x34   : > { %s2327_s10 = smov [#allocation12]   ;;  %s2815_s13 = sld [smem:[#allocation49_spill]] }
  0x35   : > { %s572_s24 = sshll.u32 %s2327_s10, 4  ;;  %s2816_s15 = sld [smem:[#allocation51_spill]]  ;;  %s573_s24 = int_to_ptr.vmem [resolvable:$true] %s572_s24 }
  0x36   : > { %s2328_s20 = smov [#allocation15]   ;;  %s2817_s17 = sld [smem:[#allocation53_spill]] }
  0x37   : > { %s636_s28 = sshll.u32 %s2813_s16, 4  ;;  %s602_s30 = sshll.u32 %s2328_s20, 4  ;;  %s637_s28 = int_to_ptr.hbm [resolvable:$true] %s636_s28  ;;  %s603_s30 = int_to_ptr.vmem [resolvable:$true] %s602_s30 }
  0x38   : > { %1728 = dma.hbm_to_vmem [thread:$0]  (!%p2489_p6), %s637_s28, 16, %s639_s0, [#allocation20]  }
  0x39   : > { %s570_s29 = sshll.u32 %s2814_s9, 4  ;;  %s2329_s28 = smov [#allocation18]   ;;  %s571_s29 = int_to_ptr.hbm [resolvable:$true] %s570_s29 }
  0x3a   : > { %s600_s7 = sshll.u32 %s2815_s13, 4  ;;  %s626_s12 = sshll.u32 %s2329_s28, 4  ;;  %s601_s7 = int_to_ptr.hbm [resolvable:$true] %s600_s7  ;;  %s627_s12 = int_to_ptr.vmem [resolvable:$true] %s626_s12 }
  0x3b   : > { %1713 = dma.hbm_to_vmem [thread:$0]  (!%p2489_p6), %s571_s29, 16, %s573_s24, [#allocation11]  }
  0x3c   : > { %s624_s27 = sshll.u32 %s2816_s15, 4  ;;  %s648_s29 = sshll.u32 %s2817_s17, 4  ;;  %s625_s27 = int_to_ptr.hbm [resolvable:$true] %s624_s27  ;;  %s649_s29 = int_to_ptr.hbm [resolvable:$true] %s648_s29 }
  0x3d   : > { %1719 = dma.hbm_to_vmem [thread:$0]  (!%p2489_p6), %s601_s7, 16, %s603_s30, [#allocation14]  }
  0x3e   : > { %1725 = dma.hbm_to_vmem [thread:$0]  (!%p2489_p6), %s625_s27, 16, %s627_s12, [#allocation17]  }
  0x3f   : > { %s2818_s19 = sld [smem:[#allocation55_spill]]  ;;  %s2330_s7 = smov [#allocation21]  }
  0x40   : > { %s650_s8 = sshll.u32 %s2330_s7, 4  ;;  %s2331_s18 = smov [#allocation22]   ;;  %s651_s8 = int_to_ptr.vmem [resolvable:$true] %s650_s8 }
  0x41   : > { %1731 = dma.hbm_to_vmem [thread:$0]  (!%p2489_p6), %s649_s29, 16, %s651_s8, [#allocation20]  }
  0x42   : > { %s665_s20 = sshll.u32 %s2331_s18, 4  ;;  %s1518_s27 = sadd.s32 4294967294, %s2320_s25   ;;  %s666_s20 = int_to_ptr.vmem [resolvable:$true] %s665_s20 }
  0x43   : > { %s56_s30 = sadd.s32 1, %s2316_s2  ;;  %s63_s28 = sadd.s32 1, %s2308_s23 }
  0x44   : > { %p58_p7 = scmp.ge.s32.totalorder %s56_s30, 2  ;;  %p70_p8 = scmp.ne.s32.totalorder %s2308_s23, %s2304_s22 }
  0x45   : > { %s663_s21 = sshll.u32 %s2818_s19, 4  ;;  %p71_p9 = scmp.eq.s32.totalorder %s2320_s25, 0  ;;  %s664_s21 = int_to_ptr.hbm [resolvable:$true] %s663_s21 }
  0x46   : > { %1734 = dma.hbm_to_vmem [thread:$0]  (!%p2489_p6), %s664_s21, 16, %s666_s20, [#allocation23]  }
  0x47   : > { %s2844_s30 = smov (%p58_p7, %s56_s30), 0  ;;  %p2545_p10 = por %p71_p9, %p70_p8 }
  0x48   : > { %2819 = sst [smem:[#allocation36_spill]] %s2844_s30  ;;  %p76_p11 = scmp.ne.s32.totalorder %s2304_s22, %s2300_s1 }
  0x49   : > { %s60_s26 = ssub.s32 %s2316_s2, %s2844_s30  ;;  %p506_p12 = scmp.eq.s32.totalorder %s2469_s3, 1 }
  0x4a   : > { %p61_p13 = scmp.eq.s32.totalorder %s60_s26, 0  ;;  %p2556_p0 = por %p77_p1, %p76_p11 }
  0x4b   : > { %p2560_p2 = por %p506_p12, %p70_p8  ;;  %p512_p5 = scmp.eq.s32.totalorder %s1518_s27, 1 }
  0x4c   : > { %s2565_s29 = scalar_select %p61_p13, %s2308_s23, %s63_s28  }
  0x4d   : > { %p2567_p6 = por %p512_p5, %p76_p11  ;;  %p1756_p7 = scmp.lt.s32.totalorder %s2320_s25, 2 }
  0x4e   : > { %2823 = sst [smem:[#allocation37_spill]] %s2565_s29  ;;  %s676_s11 = sand.u32 1, %s2308_s23  }
  0x4f   : > { %s1532_s21 = sshll.u32 %s2316_s2, 2  ;;  %s1531_s7 = sshll.u32 %s676_s11, 2 }
  0x50   : > { %s2825_s20 = sld [smem:[#allocation38_spill]]  ;;  %s680_s13 = scalar_lea.vmem [#allocation4], %s1531_s7 }
  0x51   : > { %s688_s14 = sshll.u32 %s680_s13, 4  ;;  %p1736_p8 = pnand %p1756_p7, %p2545_p10  ;;  %s689_s14 = int_to_ptr.vmem [resolvable:$true] %s688_s14 }
  0x52   : > { %s695_s27 = sand.u32 1, %s2320_s25   ;;  %s2826_s16 = sld [smem:[#allocation39_spill]] }
  0x53   : > { %s677_s19 = scalar_lea.sflag [#allocation5], %s676_s11  ;;  %s698_s29 = scalar_lea.vmem [#allocation7], %s676_s11 }
  0x54   : > { %s705_s23 = sshll.u32 %s698_s29, 4  ;;  %s2587_s13 = sand.u32 (!%p2477_p3), 1, %s2304_s22   ;;  %s706_s23 = int_to_ptr.vmem [resolvable:$true] %s705_s23 }
  0x55   : > { %s1534_s15 = sshll.u32 (!%p2477_p3), %s2587_s13, 2 }
  0x56   : > { %s684_s26 = scalar_lea.hbm %s2825_s20, %s1532_s21  ;;  %s696_s21 = scalar_lea.sflag [#allocation8], %s695_s27 }
  0x57   : > { %s686_s9 = sshll.u32 %s684_s26, 4  ;;  %714 = sbr.rel (%p2477_p3) target bundleno = 1887 (0x75f), region = 100  ;;  %s687_s9 = int_to_ptr.hbm [resolvable:$true] %s686_s9 }
  0x58   : > { %s701_s17 = scalar_lea.hbm %s2826_s16, %s2316_s2  ;;  %s717_s16 = scalar_lea.sflag (!%p2477_p3), [#allocation5], %s2587_s13 }
  0x59   : > { %1738 = dma.hbm_to_vmem [thread:$0]  (!%p1736_p8), %s687_s9, 64, %s689_s14, %s677_s19  }
  0x5a   : > { %s703_s30 = sshll.u32 %s701_s17, 4  ;;  %s720_s12 = scalar_lea.vmem (!%p2477_p3), [#allocation4], %s1534_s15  ;;  %s704_s30 = int_to_ptr.hbm [resolvable:$true] %s703_s30 }
  0x5b   : > { %1741 = dma.hbm_to_vmem [thread:$0]  (!%p1736_p8), %s704_s30, 16, %s706_s23, %s696_s21  }
  0x5c   : > { %2263 = dma.done.wait (%p2556_p0), %s717_s16, 64  }
  0x5d   : > { %2265 = vsyncadd (%p2556_p0), %s717_s16, 4294967232  ;;  %s726_s9 = sand.u32 1, %s2469_s3   ;;  %s729_s17 = scalar_lea.vmem [#allocation7], %s2587_s13 }
  0x5e   : > { %s727_s14 = scalar_lea.sflag [#allocation8], %s726_s9 }
  0x5f   : > { %2267 = dma.done.wait (%p2556_p0), %s727_s14, 16  }
  0x60   : > { %2269 = vsyncadd (%p2556_p0), %s727_s14, 4294967280 }
  0x61   : > { %2271 = dma.done.wait (%p77_p1), [#allocation8], 16  }
  0x62   : > { %2273 = vsyncadd (%p77_p1), [#allocation8], 4294967280 }
  0x63   : > { %2275 = dma.done.wait (%p77_p1), [#allocation11], 32  }
  0x64   : > { %2277 = vsyncadd (%p77_p1), [#allocation11], 4294967264 }
  0x65   : > { %2279 = dma.done.wait (%p77_p1), [#allocation14], 32  }
  0x66   : > { %2281 = vsyncadd (%p77_p1), [#allocation14], 4294967264 }
  0x67   : > { %2283 = dma.done.wait (%p77_p1), [#allocation17], 32  }
  0x68   : > { %2285 = vsyncadd (%p77_p1), [#allocation17], 4294967264 }
  0x69   : > { %2287 = dma.done.wait (%p77_p1), [#allocation20], 32  }
  0x6a   : > { %2289 = vsyncadd (%p77_p1), [#allocation20], 4294967264 }
  0x6b   : > { %2291 = dma.done.wait (%p77_p1), [#allocation23], 16  }
  0x6c   : > { %2293 = vsyncadd (%p77_p1), [#allocation23], 4294967280  ;;  %s2827_s4 = sld [smem:[#allocation41_spill]]  ;;  %v846_v4 = vld [vmem:[%s720_s12] sm:$0xf]  ;;  %vm867_vm0 = vcmask 261120  }
  0x6d   : > { %s2828_s29 = sld [smem:[#allocation40_spill]]  ;;  %v2637_v5 = vld [vmem:[%s720_s12] sm:$0xf]  ;;  %v1827_v6 = vld [vmem:[#allocation9] ss:$0 sm:$0xff]  ;;  %vm918_vm1 = vcmask 257024  }
  0x6e   : > { %v1828_v12 = vld [vmem:[%s2762_s6] ss:$0 sm:$0xff]  ;;  %s2829_s28 = sld [smem:[#allocation42_spill]]  ;;  %vm994_vm2 = vcmask 64512   ;;  %v1829_v29 = vld [vmem:[#allocation10] ss:$0 sm:$0xff]  ;;  %v1065_v51 = vunpack.c.l.bf16 %v2637_v5 }
  0x6f   : > { %v928_v20 = vld [vmem:[%s729_s17] sm:$0x1]  ;;  %vm1011_vm3 = vcmask 1043456   ;;  %v1645_v41 = vld [vmem:[%s2761_s5 + $0x8] sm:$0xff]  ;;  %v1830_v50 = vld [vmem:[#allocation12] ss:$0 sm:$0xff] }
  0x70   : > { %v929_v21 = vsub.f32 1.0, %v928_v20  ;;  %v1644_v42 = vld [vmem:[%s2761_s5] sm:$0xff]  ;;  %v2332_v57 = vmov 32.0   ;;  %s2830_s23 = sld [smem:[#allocation46_spill]]  ;;  %v1832_v20 = vld [vmem:[#allocation18] ss:$0 sm:$0xff] }
  0x71   : > { %s2832_s18 = sld [smem:[#allocation48_spill]]  ;;  %s1545_s21 = sshll.u32 %s2587_s13, 3 }
  0x72   : > { %v1639_v0 = vld [vmem:[%s2827_s4 + $0x8] sm:$0xff]  ;;  %v1638_v2 = vld [vmem:[%s2827_s4] sm:$0xff]  ;;  %v930_v22 = vmul.f32 -1e+09, %v929_v21  ;;  %s2833_s8 = sld [smem:[#allocation54_spill]]  ;;  %s840_s14 = scalar_lea.vmem [#allocation24], %s1545_s21 }
  0x73   : > { %v1643_v1 = vld [vmem:[%s2828_s29 + $0x8] sm:$0xff]  ;;  %877 = vmatpush.bf16.msra.mxu0 %v1639_v0  ;;  %v1642_v3 = vld [vmem:[%s2828_s29] sm:$0xff]  ;;  %s2834_s26 = sld [smem:[#allocation35_spill]]  ;;  %s1319_s17 = sshll.u32 %s840_s14, 4  ;;  %s1320_s17 = int_to_ptr.vmem [resolvable:$true] %s1319_s17 }
  0x74   : > { %961 = vmatpush.bf16.msra.mxu2 %v1643_v1  ;;  %v1641_v18 = vld [vmem:[%s2829_s28 + $0x8] sm:$0xff]  ;;  %v1640_v19 = vld [vmem:[%s2829_s28] sm:$0xff]  ;;  %v991_v23 = vperm.slane %v930_v22, 0  ;;  %s2835_s12 = sld [smem:[#allocation56_spill]] }
  0x75   : > { %910 = vmatpush.bf16.msra.mxu1 %v1641_v18 }
  0x76   : > { %s2831_s30 = smov %s2830_s23 }
  0x77   : > { %878 = vmatpush.bf16.msra.mxu0 %v1638_v2 }
  0x78   : > { %962 = vmatpush.bf16.msra.mxu2 %v1642_v3 }
  0x79   : > { %911 = vmatpush.bf16.msra.mxu1 %v1640_v19  ;;  %s1635_s27 = sshll.u32 %s2834_s26, 3 }
  0x7a   : > { %1554 = vmatmul.msk.bf16.vlgmr.msra.gmra.mxu0 %vm867_vm0, %v846_v4  ;;  %s1317_s9 = scalar_lea.hbm %s2835_s12, %s1635_s27  ;;  %s2230_s20 = scalar_lea.hbm %s2835_s12, 16 }
  0x7b   : > { %1572 = vmatmul.msk.bf16.vlgmr.msra.gmra.mxu2 %vm867_vm0, %v2637_v5  ;;  %v1647_v5 = vld [vmem:[%s2830_s23 + $0x8] sm:$0xff]  ;;  %s1321_s19 = sshll.u32 %s1317_s9, 4  ;;  %s1306_s23 = scalar_lea.sflag [#allocation6], %s2587_s13  ;;  %s1322_s19 = int_to_ptr.hbm [resolvable:$true] %s1321_s19 }
  0x7c   : > { %1563 = vmatmul.msk.bf16.vlgmr.msra.gmra.mxu1 %vm867_vm0, %v846_v4  ;;  %1136 = vmatpush.bf16.msrb.mxu2 %v1647_v5  ;;  %s2224_s0 = sshra.s32 %s1322_s19, 4  ;;  %s2225_s0 = int_to_ptr.hbm [resolvable:$true] %s2224_s0 }
  0x7d   : > { %1058 = vmatpush.bf16.msrb.mxu1 %v1645_v41  ;;  %s2226_s11 = scalar_lea.hbm %s2225_s0, 8  ;;  %p2231_p10 = scmp.lt.s32.totalorder %s2225_s0, %s2835_s12 }
  0x7e   : > { %p2227_p1 = scmp.ne.s32.totalorder %s2225_s0, %s2226_s11  ;;  %p2232_p11 = scmp.lt.s32.totalorder %s2230_s20, %s2226_s11 }
  0x80   : > { %p2228_p3 = pnand %p2227_p1, %p2560_p2  ;;  %p2233_p12 = por %p2232_p11, %p2231_p10 }
  0x81   : > { %1059 = vmatpush.bf16.msrb.mxu1 %v1644_v42 }
  0x82   : > { %p2229_p9 = pneg %p2228_p3 }
  0x84   : > { %p2234_p13 = pnand %p2233_p12, %p2229_p9 }
  0xf7   : > { %v880_v7 = vpop.f32.mrf.mxu0 }
  0xf8   : > { %v881_v8 = vadd.f32 %v1827_v6, %v880_v7  ;;  %v1646_v6 = vld [vmem:[%s2831_s30] sm:$0xff]  ;;  %v1655_v7 = vld [vmem:[%s2832_s18 + $0x38] sm:$0xff] }
  0xf9   : > { %v913_v30 = vpop.f32.mrf.mxu1  ;;  %1137 = vmatpush.bf16.msrb.mxu2 %v1646_v6 }
  0xfa   : > { %v917_v9 = vpack.c.bf16 %v881_v8, %v881_v8  ;;  %v914_v31 = vadd.f32 %v1829_v29, %v913_v30  ;;  %v1649_v29 = vld [vmem:[%s2832_s18 + $0x8] sm:$0xff]  ;;  %v1648_v30 = vld [vmem:[%s2832_s18] sm:$0xff] }
  0xfc   : > { %919 = vst.msk [vmem:[#allocation2] sm:$0xf] %vm918_vm1, %v917_v9  ;;  %v920_v32 = vpack.c.bf16 %v914_v31, %v914_v31  ;;  %v1833_v31 = vld [vmem:[#allocation13] ss:$0 sm:$0xff] }
  0xfe   : > { %v964_v10 = vpop.f32.mrf.mxu2  ;;  %921 = vst.msk [vmem:[#allocation3] sm:$0xf] %vm918_vm1, %v920_v32 }
  0xff   : > { %v882_v11 = vpop.f32.mrf.mxu0  ;;  %v965_v14 = vadd.f32 %v1828_v12, %v964_v10 }
 0x101   : > { %v968_v17 = vpack.c.bf16 %v965_v14, %v965_v14  ;;  %v915_v33 = vpop.f32.mrf.mxu1 }
 0x103   : > { %v969_v13 = vld [vmem:[#allocation2] sm:$0xf] }
 0x104   : > { %v974_v15 = vsel %vm867_vm0, %v969_v13, 0 }
 0x105   : > { %983 = vmatpush.bf16.xpose.msra.mxu3 %v974_v15  ;;  %v1007_v36 = vld [vmem:[#allocation3] sm:$0xf] }
 0x106   : > { %v966_v16 = vpop.f32.mrf.mxu2  ;;  %v1013_v37 = vsel %vm1011_vm3, %v1007_v36, 0 }
 0x107   : > { %1022 = vmatpush.bf16.msrb.mxu0 %v1013_v37 }
 0x10c   : > { %1573 = vmatmul.msk.bf16.vlgmr.msra.gmra.mxu3 %vm867_vm0, %v968_v17  ;;  %v1831_v17 = vld [vmem:[#allocation16] ss:$0 sm:$0xff] }
 0x10d   : > { %1221 = vmatpush.bf16.msrb.mxu3 %v1655_v7  ;;  %v1836_v7 = vld [vmem:[#allocation21] ss:$0 sm:$0xff] }
 0x18f   : > { %v985_v24 = vpop.f32.mrf.mxu3 }
 0x190   : > { %v989_v25 = vmul.f32 0.17677669, %v985_v24  ;;  %v1654_v24 = vld [vmem:[%s2832_s18 + $0x30] sm:$0xff] }
 0x191   : > { %1222 = vmatpush.bf16.msrb.mxu3 %v1654_v24 }
 0x192   : > { %v993_v26 = vadd.f32 %v991_v23, %v989_v25  ;;  %v1653_v25 = vld [vmem:[%s2832_s18 + $0x28] sm:$0xff] }
 0x194   : > { %v995_v27 = vsel %vm994_vm2, %v993_v26, -inf }
 0x195   : > { %996 = vmax.xlane.f32.xlu0 %v995_v27  ;;  %1223 = vmatpush.bf16.msrb.mxu3 %v1653_v25  ;;  %v1651_v27 = vld [vmem:[%s2832_s18 + $0x18] sm:$0xff] }
 0x197   : > { %v987_v28 = vpop.f32.mrf.mxu3 }
 0x198   : > { %v1650_v28 = vld [vmem:[%s2832_s18 + $0x10] sm:$0xff] }
 0x208   : > { %v997_v34 = vpop.xlane.xlu0 %996 }
 0x209   : > { %v998_v35 = vsub.f32 %v993_v26, %v997_v34  ;;  %v1652_v26 = vld [vmem:[%s2832_s18 + $0x20] sm:$0xff] }
 0x20a   : > { %1224 = vmatpush.bf16.msrb.mxu3 %v1652_v26 }
 0x20b   : > { %v999_v38 = vmul.f32 1.442695, %v998_v35 }
 0x20d   : > { %1838 = vpow2.f32 %v999_v38 }
 0x20e   : > { %1225 = vmatpush.bf16.msrb.mxu3 %v1651_v27 }
 0x212   : > { %1226 = vmatpush.bf16.msrb.mxu3 %v1650_v28 }
 0x213   : > { %v1839_v39 = vpop.eup %1838 }
 0x214   : > { %v1001_v40 = vsel %vm994_vm2, %v1839_v39, 0.0 }
 0x215   : > { %1002 = vadd.xlane.f32.xlu0 %v1001_v40 }
 0x216   : > { %1227 = vmatpush.bf16.msrb.mxu3 %v1649_v29 }
 0x21a   : > { %1228 = vmatpush.bf16.msrb.mxu3 %v1648_v30 }
 0x288   : > { %v1003_v43 = vpop.xlane.xlu0 %1002 }
 0x289   : > { %1840 = vrcp.f32 %v1003_v43 }
 0x28a   : > { %1842 = vrcp.f32 %v2332_v57  ;;  %v1656_v57 = vld [vmem:[%s2833_s8] sm:$0xff] }
 0x28f   : > { %v1841_v44 = vpop.eup %1840 }
 0x290   : > { %v1005_v45 = vmul.f32 %v1841_v44, %v1839_v39  ;;  %v1843_v58 = vpop.eup %1842 }
 0x291   : > { %v1071_v59 = vmul.f32 32.0, %v1843_v58  ;;  %vm1075_vm4 = vweird.f32 %v1843_v58 }
 0x292   : > { %v1006_v46 = vpack.c.bf16 %v1005_v45, %v1005_v45  ;;  %v1834_v45 = vld [vmem:[#allocation15] ss:$0 sm:$0xff] }
 0x293   : > { %v1072_v60 = vsub.f32 1.0, %v1071_v59 }
 0x294   : > { %1574 = vmatmul.msk.bf16.vlgmr.msrb.gmra.mxu0 %vm994_vm2, %v1006_v46 }
 0x295   : > { %v1073_v61 = vmul.f32 %v1843_v58, %v1072_v60 }
 0x297   : > { %v1074_v62 = vadd.f32 %v1843_v58, %v1073_v61 }
 0x299   : > { %v2670_v63 = vsel %vm1075_vm4, %v1843_v58, %v1074_v62 }
 0x311   : > { %v1024_v47 = vpop.f32.mrf.mxu0 }
 0x312   : > { %v1028_v48 = vpack.c.bf16 %v1024_v47, %v1024_v47 }
 0x314   : > { %1583 = vmatmul.msk.bf16.vlgmr.msrb.gmra.mxu1 %vm867_vm0, %v1028_v48 }
 0x319   : > { %v1026_v49 = vpop.f32.mrf.mxu0 }
 0x391   : > { %v1061_v52 = vpop.f32.mrf.mxu1 }
 0x392   : > { %v1062_v53 = vadd.f32 %v1830_v50, %v1061_v52 }
 0x394   : > { %v1066_v54 = vadd.f32 %v1065_v51, %v1062_v53 }
 0x396   : > { %v1067_v55 = vsel %vm867_vm0, %v1066_v54, 0.0 }
 0x397   : > { %1068 = vadd.xlane.f32.xlu1 %v1067_v55 }
 0x399   : > { %v1063_v56 = vpop.f32.mrf.mxu1 }
 0x39a   : > { %v1657_v56 = vld [vmem:[%s2833_s8 + $0x8] sm:$0xff] }
 0x39b   : > { %1297 = vmatpush.bf16.msra.mxu0 %v1657_v56 }
 0x39f   : > { %1298 = vmatpush.bf16.msra.mxu0 %v1656_v57 }
 0x40a   : > { %v1069_v0 = vpop.xlane.xlu1 %1068 }
 0x40b   : > { %v1077_v1 = vmul.f32 %v2670_v63, %v1069_v0 }
 0x40d   : > { %v1078_v2 = vsub.f32 %v1066_v54, %v1077_v1 }
 0x40f   : > { %v1079_v3 = vmul.f32 %v1078_v2, %v1078_v2 }
 0x411   : > { %v1080_v4 = vsel %vm867_vm0, %v1079_v3, 0.0 }
 0x412   : > { %1081 = vadd.xlane.f32.xlu1 %v1080_v4  ;;  %v1835_v4 = vld [vmem:[#allocation19] ss:$0 sm:$0xff] }
 0x485   : > { %v1082_v8 = vpop.xlane.xlu1 %1081 }
 0x486   : > { %v1083_v9 = vmul.f32 %v1082_v8, %v2670_v63 }
 0x488   : > { %v1084_v10 = vadd.f32 1e-12, %v1083_v9 }
 0x48a   : > { %1844 = vrsqrt.f32 %v1084_v10  ;;  %vm1091_vm6 = vweird.f32 %v1084_v10 }
 0x490   : > { %v1845_v11 = vpop.eup %1844 }
 0x491   : > { %v1086_v12 = vmul.f32 %v1845_v11, %v1084_v10  ;;  %vm1092_vm5 = vweird.f32 %v1845_v11  ;;  %v1837_v10 = vld [vmem:[#allocation22] ss:$0 sm:$0xff] }
 0x492   : > { %vm1093_vm7 = vmor %vm1091_vm6, %vm1092_vm5 }
 0x493   : > { %v1087_v13 = vmul.f32 %v1845_v11, %v1086_v12 }
 0x495   : > { %v1088_v14 = vmul.f32 0.5, %v1087_v13 }
 0x497   : > { %v1089_v15 = vsub.f32 1.5, %v1088_v14 }
 0x499   : > { %v1090_v16 = vmul.f32 %v1845_v11, %v1089_v15 }
 0x49b   : > { %v1094_v18 = vsel %vm1093_vm7, %v1845_v11, %v1090_v16 }
 0x49c   : > { %v1095_v19 = vmul.f32 %v1094_v18, %v1078_v2 }
 0x49e   : > { %v1100_v21 = vmul.f32 %v1831_v17, %v1095_v19 }
 0x4a0   : > { %v1105_v22 = vadd.f32 %v1832_v20, %v1100_v21 }
 0x4a2   : > { %v1106_v23 = vpack.c.bf16 %v1105_v22, %v1105_v22 }
 0x4a4   : > { %1592 = vmatmul.msk.bf16.vlgmr.msrb.gmra.mxu2 %vm867_vm0, %v1106_v23 }
 0x527   : > { %v1139_v32 = vpop.f32.mrf.mxu2 }
 0x528   : > { %v1140_v33 = vadd.f32 %v1833_v31, %v1139_v32 }
 0x52a   : > { %v1143_v34 = vmul.f32 %v1140_v33, %v1140_v33 }
 0x52c   : > { %v1144_v35 = vmul.f32 %v1143_v34, %v1140_v33 }
 0x52e   : > { %v1145_v36 = vmul.f32 0.044715, %v1144_v35 }
 0x52f   : > { %v1141_v37 = vpop.f32.mrf.mxu2 }
 0x530   : > { %v1146_v38 = vadd.f32 %v1145_v36, %v1140_v33 }
 0x532   : > { %v1147_v39 = vmul.f32 0.7978846, %v1146_v38 }
 0x534   : > { %1846 = vtanh.f32 %v1147_v39 }
 0x53a   : > { %v1847_v40 = vpop.eup %1846 }
 0x53b   : > { %v1149_v41 = vadd.f32 1.0, %v1847_v40 }
 0x53d   : > { %v1150_v42 = vmul.f32 0.5, %v1149_v41 }
 0x53f   : > { %v1151_v43 = vmul.f32 %v1150_v42, %v1140_v33 }
 0x541   : > { %v1152_v44 = vpack.c.bf16 %v1151_v43, %v1151_v43 }
 0x543   : > { %1229 = vmatmul.bf16.vlgmr.msrb.gmra.mxu3 %v1152_v44 }
 0x5c6   : > { %v1230_v46 = vpop.f32.mrf.mxu3 }
 0x5c7   : > { %v1231_v47 = vadd.f32 %v1834_v45, %v1230_v46 }
 0x5c9   : > { %v1234_v48 = vadd.f32 %v1231_v47, %v1105_v22 }
 0x5cb   : > { %v1235_v49 = vsel %vm867_vm0, %v1234_v48, 0.0 }
 0x5cc   : > { %1236 = vadd.xlane.f32.xlu2 %v1235_v49 }
 0x5ce   : > { %v1232_v50 = vpop.f32.mrf.mxu3 }
 0x63f   : > { %v1237_v51 = vpop.xlane.xlu2 %1236 }
 0x640   : > { %v1238_v52 = vmul.f32 %v1237_v51, %v2670_v63 }
 0x642   : > { %v1239_v53 = vsub.f32 %v1234_v48, %v1238_v52 }
 0x644   : > { %v1240_v54 = vmul.f32 %v1239_v53, %v1239_v53 }
 0x646   : > { %v1241_v55 = vsel %vm867_vm0, %v1240_v54, 0.0 }
 0x647   : > { %1242 = vadd.xlane.f32.xlu2 %v1241_v55 }
 0x6ba   : > { %v1243_v58 = vpop.xlane.xlu2 %1242 }
 0x6bb   : > { %v1244_v59 = vmul.f32 %v1243_v58, %v2670_v63 }
 0x6bd   : > { %v1245_v60 = vadd.f32 1e-12, %v1244_v59 }
 0x6bf   : > { %1848 = vrsqrt.f32 %v1245_v60  ;;  %vm1252_vm9 = vweird.f32 %v1245_v60 }
 0x6c5   : > { %v1849_v61 = vpop.eup %1848 }
 0x6c6   : > { %v1247_v62 = vmul.f32 %v1849_v61, %v1245_v60  ;;  %vm1253_vm8 = vweird.f32 %v1849_v61 }
 0x6c7   : > { %vm1254_vm10 = vmor %vm1252_vm9, %vm1253_vm8 }
 0x6c8   : > { %v1248_v0 = vmul.f32 %v1849_v61, %v1247_v62 }
 0x6ca   : > { %v1249_v1 = vmul.f32 0.5, %v1248_v0 }
 0x6cc   : > { %v1250_v2 = vsub.f32 1.5, %v1249_v1 }
 0x6ce   : > { %v1251_v3 = vmul.f32 %v1849_v61, %v1250_v2 }
 0x6d0   : > { %v1255_v5 = vsel %vm1254_vm10, %v1849_v61, %v1251_v3 }
 0x6d1   : > { %v1256_v6 = vmul.f32 %v1255_v5, %v1239_v53 }
 0x6d3   : > { %v1261_v8 = vmul.f32 %v1835_v4, %v1256_v6 }
 0x6d5   : > { %v1266_v63 = vadd.f32 %v1836_v7, %v1261_v8 }
 0x6d7   : > { %v1267_v9 = vpack.c.bf16 %v1266_v63, %v1266_v63 }
 0x6d9   : > { %1633 = vmatmul.msk.bf16.vlgmr.msra.gmra.mxu0 %vm867_vm0, %v1267_v9 }
 0x756   : > { %v1300_v11 = vpop.f32.mrf.mxu0 }
 0x757   : > { %v1301_v12 = vadd.f32 %v1837_v10, %v1300_v11 }
 0x759   : > { %1304 = vst [vmem:[%s840_s14] sm:$0xff] %v1301_v12 }
 0x75a   : > { %2237 = shalt.err (!%p2234_p13)
}
 0x75b   : > { %1702 = dma.vmem_to_hbm [thread:$0]  (%p2560_p2), %s1320_s17, 128, %s1322_s19, %s1306_s23  }
 0x75e   : > { %v1302_v13 = vpop.f32.mrf.mxu0 }
 0x75f PF: > { %s1333_s13 = sand.u32 1, %s2300_s1   ;;  %p1743_p0 = pnand %p1530_p4, %p2567_p6 }
 0x760   : > { %s1334_s21 = scalar_lea.sflag [#allocation6], %s1333_s13 }
 0x761   : > { %p1744_p5 = pneg %p1743_p0 }
 0x763   : > { %2295 = dma.done.wait (%p1744_p5), %s1334_s21, 128  }
 0x764   : > { %2297 = vsyncadd (%p1744_p5), %s1334_s21, 4294967168  ;;  %s44_s25 = sadd.s32 1, %s2320_s25   ;;  %s2836_s15 = sld [smem:[#allocation34_spill]] }
 0x765   : > { %p41_p7 = scmp.ge.s32.totalorder %s44_s25, 4   ;;  %s2837_s23 = sld [smem:[#allocation37_spill]] }
 0x766   : > { %s2838_s10 = sld [smem:[#allocation36_spill]]  ;;  %s2839_s1 = smov %s2304_s22 }
 0x767   : > { %s2841_s24 = smov %s2316_s2 }
 0x768   :  { %43 = sbr.rel (!%p41_p7) target bundleno = 33 (0x21), region = 203 }
 0x76a   : > { %s2840_s22 = smov %s2836_s15 }
 0x76c   : > { %s2842_s2 = smov %s2838_s10 }
 0x76d   :  { %1340 = vsyncpa [#allocation5], 1 }
 0x76e   :  { %1342 = vsyncpa [#allocation5 + $0x1], 1 }
 0x76f   :  { %1343 = vsyncpa [#allocation8], 1 }
 0x770   :  { %1345 = vsyncpa [#allocation8 + $0x1], 1 }
 0x771   :  { %1346 = vsyncpa [#allocation11], 1 }
 0x772   :  { %1347 = vsyncpa [#allocation14], 1 }
 0x773   :  { %1348 = vsyncpa [#allocation17], 1 }
 0x774   :  { %1349 = vsyncpa [#allocation20], 1 }
 0x775   :  { %1350 = vsyncpa [#allocation23], 1 }
 0x776   :  { %1351 = vsyncpa [#allocation6], 1 }
 0x777   :  { %1353 = vsyncpa [#allocation6 + $0x1], 1 }

// kernel: tpu_custom_call.1
= control target key start
LH: loop header
LB: loop body
LE: loop exit
PB: predicated region body
PF: predicated region fallthrough
CT: control target
= control target key end

     0   :  { %s2756_s0 = inlined_call_operand.hbm [shape: bf16[2,8,32], index: 0, kind: input, shape index: {}]   ;;  %s2757_s1 = inlined_call_operand.hbm [shape: f32[2,1,8], index: 1, kind: input, shape index: {}]   ;;  %s2758_s2 = inlined_call_operand.vmem [shape: bf16[32,32], index: 2, kind: input, shape index: {}]   ;;  %s2759_s3 = inlined_call_operand.vmem [shape: bf16[32,32], index: 3, kind: input, shape index: {}]   ;;  %s2760_s4 = inlined_call_operand.vmem [shape: bf16[32,32], index: 4, kind: input, shape index: {}]   ;;  %s2761_s5 = inlined_call_operand.vmem [shape: bf16[32,32], index: 5, kind: input, shape index: {}]   ;;  %s2762_s6 = inlined_call_operand.vmem [shape: f32[1,32], index: 6, kind: input, shape index: {}]   ;;  %s2763_s7 = inlined_call_operand.hbm [shape: f32[1,32], index: 7, kind: input, shape index: {}]   ;;  %s2764_s8 = inlined_call_operand.hbm [shape: f32[1,32], index: 8, kind: input, shape index: {}]   ;;  %s2765_s9 = inlined_call_operand.hbm [shape: f32[1,32], index: 9, kind: input, shape index: {}]   ;;  %s2766_s10 = inlined_call_operand.vmem [shape: bf16[32,128], index: 10, kind: input, shape index: {}]   ;;  %s2767_s11 = inlined_call_operand.hbm [shape: f32[1,128], index: 11, kind: input, shape index: {}]   ;;  %s2768_s12 = inlined_call_operand.vmem [shape: bf16[128,32], index: 12, kind: input, shape index: {}]   ;;  %s2769_s13 = inlined_call_operand.hbm [shape: f32[1,32], index: 13, kind: input, shape index: {}]   ;;  %s2770_s14 = inlined_call_operand.hbm [shape: f32[1,32], index: 14, kind: input, shape index: {}]   ;;  %s2771_s15 = inlined_call_operand.hbm [shape: f32[1,32], index: 15, kind: input, shape index: {}]   ;;  %s2772_s16 = inlined_call_operand.hbm [shape: f32[1,32], index: 16, kind: input, shape index: {}]   ;;  %s2773_s17 = inlined_call_operand.hbm [shape: f32[1,32], index: 17, kind: input, shape index: {}]   ;;  %s2774_s18 = inlined_call_operand.vmem [shape: bf16[32,128], index: 18, kind: input, shape index: {}]   ;;  %s2775_s19 = inlined_call_operand.hbm [shape: f32[1,128], index: 19, kind: input, shape index: {}]   ;;  %s2776_s20 = inlined_call_operand.hbm [shape: f32[2,8,128], index: 20, kind: output, shape index: {}]  }
   0x1   :  { %2786 = sst [smem:[#allocation38_spill]] %s2756_s0 }
   0x2   :  { %2787 = sst [smem:[#allocation39_spill]] %s2757_s1 }
   0x3   :  { %2788 = sst [smem:[#allocation40_spill]] %s2758_s2 }
   0x4   :  { %2789 = sst [smem:[#allocation41_spill]] %s2759_s3 }
   0x5   :  { %2790 = sst [smem:[#allocation42_spill]] %s2760_s4 }
   0x6   :  { %2791 = sst [smem:[#allocation43_spill]] %s2763_s7 }
   0x7   :  { %2792 = sst [smem:[#allocation44_spill]] %s2764_s8 }
   0x8   :  { %2793 = sst [smem:[#allocation45_spill]] %s2765_s9 }
   0x9   :  { %2794 = sst [smem:[#allocation46_spill]] %s2766_s10 }
   0xa   :  { %2795 = sst [smem:[#allocation47_spill]] %s2767_s11 }
   0xb   :  { %2796 = sst [smem:[#allocation48_spill]] %s2768_s12 }
   0xc   :  { %2797 = sst [smem:[#allocation49_spill]] %s2769_s13 }
   0xd   :  { %2798 = sst [smem:[#allocation50_spill]] %s2770_s14 }
   0xe   :  { %2799 = sst [smem:[#allocation51_spill]] %s2771_s15 }
   0xf   :  { %2800 = sst [smem:[#allocation52_spill]] %s2772_s16 }
  0x10   :  { %2801 = sst [smem:[#allocation53_spill]] %s2773_s17 }
  0x11   :  { %2802 = sst [smem:[#allocation54_spill]] %s2774_s18 }
  0x12   :  { %2803 = sst [smem:[#allocation55_spill]] %s2775_s19 }
  0x13   :  { %2804 = sst [smem:[#allocation56_spill]] %s2776_s20 }
  0x14   :  { %25 = vsyncpa [#allocation5], 0 }
  0x15   :  { %27 = vsyncpa [#allocation5 + $0x1], 0 }
  0x16   :  { %28 = vsyncpa [#allocation8], 0 }
  0x17   :  { %30 = vsyncpa [#allocation8 + $0x1], 0 }
  0x18   :  { %31 = vsyncpa [#allocation11], 0 }
  0x19   :  { %32 = vsyncpa [#allocation14], 0 }
  0x1a   :  { %33 = vsyncpa [#allocation17], 0 }
  0x1b   :  { %34 = vsyncpa [#allocation20], 0 }
  0x1c   :  { %35 = vsyncpa [#allocation23], 0 }
  0x1d   :  { %36 = vsyncpa [#allocation6], 0 }
  0x1e   :  { %38 = vsyncpa [#allocation6 + $0x1], 0  ;;  %s2438_s1 = smov 0   ;;  %s2440_s22 = smov 0  }
  0x1f   :  { %s2442_s23 = smov 0   ;;  %s2444_s24 = smov 0  }
  0x20   :  { %s2446_s2 = smov 0   ;;  %s2448_s25 = smov 0  }
  0x21 LB: > { %2805 = sst [smem:[#allocation34_spill]] %s2308_s23  ;;  %s2469_s3 = sadd.s32 4294967295, %s2320_s25   ;;  %s2320_s25 = sphi %s2448_s25, %s44_s25   ;;  %s2316_s2 = sphi %s2446_s2, %s2842_s2   ;;  %s2312_s24 = sphi %s2444_s24, %s2841_s24   ;;  %s2308_s23 = sphi %s2442_s23, %s2837_s23   ;;  %s2304_s22 = sphi %s2440_s22, %s2840_s22   ;;  %s2300_s1 = sphi %s2438_s1, %s2839_s1  }
  0x22   : > { %2806 = sst [smem:[#allocation35_spill]] %s2312_s24  ;;  %p1519_p0 = scmp.ge.s32.totalorder %s2320_s25, 1 }
  0x23   : > { %p77_p1 = scmp.eq.s32.totalorder %s2469_s3, 0  ;;  %p519_p2 = scmp.lt.s32.totalorder %s2320_s25, 3 }
  0x24   : > { %s2807_s7 = sld [smem:[#allocation43_spill]]  ;;  %p1530_p4 = scmp.ge.s32.totalorder %s2320_s25, 2 }
  0x25   : > { %p2477_p3 = pnand %p1519_p0, %p519_p2  ;;  %s2322_s29 = smov [#allocation9]  }
  0x26   : > { %s548_s30 = sshll.u32 %s2322_s29, 4  ;;  %s2809_s8 = sld [smem:[#allocation44_spill]]  ;;  %s549_s30 = int_to_ptr.vmem [resolvable:$true] %s548_s30 }
  0x27   : > { %p1704_p5 = pneg %p2477_p3  ;;  %s2811_s11 = sld [smem:[#allocation47_spill]] }
  0x28   : > { %s2323_s18 = smov [#allocation10]   ;;  %s2812_s14 = sld [smem:[#allocation50_spill]] }
  0x29   : > { %p2489_p6 = pnand %p1704_p5, %p77_p1  ;;  %s560_s29 = sshll.u32 %s2323_s18, 4  ;;  %s561_s29 = int_to_ptr.vmem [resolvable:$true] %s560_s29 }
  0x2a   : > { %s546_s28 = sshll.u32 %s2807_s7, 4  ;;  %s2324_s12 = smov [#allocation13]   ;;  %s547_s28 = int_to_ptr.hbm [resolvable:$true] %s546_s28 }
  0x2b   : > { %1707 = dma.hbm_to_vmem [thread:$0]  (!%p2489_p6), %s547_s28, 16, %s549_s30, [#allocation8]  }
  0x2c   : > { %s558_s20 = sshll.u32 %s2809_s8, 4  ;;  %s587_s10 = sshll.u32 %s2324_s12, 4  ;;  %s559_s20 = int_to_ptr.hbm [resolvable:$true] %s558_s20  ;;  %s588_s10 = int_to_ptr.vmem [resolvable:$true] %s587_s10 }
  0x2d   : > { %s585_s24 = sshll.u32 %s2811_s11, 4  ;;  %s2325_s7 = smov [#allocation16]   ;;  %s586_s24 = int_to_ptr.hbm [resolvable:$true] %s585_s24 }
  0x2e   : > { %1710 = dma.hbm_to_vmem [thread:$0]  (!%p2489_p6), %s559_s20, 16, %s561_s29, [#allocation11]  }
  0x2f   : > { %s612_s8 = sshll.u32 %s2812_s14, 4  ;;  %s614_s18 = sshll.u32 %s2325_s7, 4  ;;  %s613_s8 = int_to_ptr.hbm [resolvable:$true] %s612_s8  ;;  %s615_s18 = int_to_ptr.vmem [resolvable:$true] %s614_s18 }
  0x30   : > { %1716 = dma.hbm_to_vmem [thread:$0]  (!%p2489_p6), %s586_s24, 16, %s588_s10, [#allocation14]  }
  0x31   : > { %s2813_s16 = sld [smem:[#allocation52_spill]]  ;;  %s2326_s12 = smov [#allocation19]  }
  0x32   : > { %1722 = dma.hbm_to_vmem [thread:$0]  (!%p2489_p6), %s613_s8, 16, %s615_s18, [#allocation17]  }
  0x33   : > { %s2814_s9 = sld [smem:[#allocation45_spill]]  ;;  %s638_s0 = sshll.u32 %s2326_s12, 4  ;;  %s639_s0 = int_to_ptr.vmem [resolvable:$true] %s638_s0 }
  0x34   : > { %s2327_s10 = smov [#allocation12]   ;;  %s2815_s13 = sld [smem:[#allocation49_spill]] }
  0x35   : > { %s572_s24 = sshll.u32 %s2327_s10, 4  ;;  %s2816_s15 = sld [smem:[#allocation51_spill]]  ;;  %s573_s24 = int_to_ptr.vmem [resolvable:$true] %s572_s24 }
  0x36   : > { %s2328_s20 = smov [#allocation15]   ;;  %s2817_s17 = sld [smem:[#allocation53_spill]] }
  0x37   : > { %s636_s28 = sshll.u32 %s2813_s16, 4  ;;  %s602_s30 = sshll.u32 %s2328_s20, 4  ;;  %s637_s28 = int_to_ptr.hbm [resolvable:$true] %s636_s28  ;;  %s603_s30 = int_to_ptr.vmem [resolvable:$true] %s602_s30 }
  0x38   : > { %1728 = dma.hbm_to_vmem [thread:$0]  (!%p2489_p6), %s637_s28, 16, %s639_s0, [#allocation20]  }
  0x39   : > { %s570_s29 = sshll.u32 %s2814_s9, 4  ;;  %s2329_s28 = smov [#allocation18]   ;;  %s571_s29 = int_to_ptr.hbm [resolvable:$true] %s570_s29 }
  0x3a   : > { %s600_s7 = sshll.u32 %s2815_s13, 4  ;;  %s626_s12 = sshll.u32 %s2329_s28, 4  ;;  %s601_s7 = int_to_ptr.hbm [resolvable:$true] %s600_s7  ;;  %s627_s12 = int_to_ptr.vmem [resolvable:$true] %s626_s12 }
  0x3b   : > { %1713 = dma.hbm_to_vmem [thread:$0]  (!%p2489_p6), %s571_s29, 16, %s573_s24, [#allocation11]  }
  0x3c   : > { %s624_s27 = sshll.u32 %s2816_s15, 4  ;;  %s648_s29 = sshll.u32 %s2817_s17, 4  ;;  %s625_s27 = int_to_ptr.hbm [resolvable:$true] %s624_s27  ;;  %s649_s29 = int_to_ptr.hbm [resolvable:$true] %s648_s29 }
  0x3d   : > { %1719 = dma.hbm_to_vmem [thread:$0]  (!%p2489_p6), %s601_s7, 16, %s603_s30, [#allocation14]  }
  0x3e   : > { %1725 = dma.hbm_to_vmem [thread:$0]  (!%p2489_p6), %s625_s27, 16, %s627_s12, [#allocation17]  }
  0x3f   : > { %s2818_s19 = sld [smem:[#allocation55_spill]]  ;;  %s2330_s7 = smov [#allocation21]  }
  0x40   : > { %s650_s8 = sshll.u32 %s2330_s7, 4  ;;  %s2331_s18 = smov [#allocation22]   ;;  %s651_s8 = int_to_ptr.vmem [resolvable:$true] %s650_s8 }
  0x41   : > { %1731 = dma.hbm_to_vmem [thread:$0]  (!%p2489_p6), %s649_s29, 16, %s651_s8, [#allocation20]  }
  0x42   : > { %s665_s20 = sshll.u32 %s2331_s18, 4  ;;  %s1518_s27 = sadd.s32 4294967294, %s2320_s25   ;;  %s666_s20 = int_to_ptr.vmem [resolvable:$true] %s665_s20 }
  0x43   : > { %s56_s30 = sadd.s32 1, %s2316_s2  ;;  %s63_s28 = sadd.s32 1, %s2308_s23 }
  0x44   : > { %p58_p7 = scmp.ge.s32.totalorder %s56_s30, 2  ;;  %p70_p8 = scmp.ne.s32.totalorder %s2308_s23, %s2304_s22 }
  0x45   : > { %s663_s21 = sshll.u32 %s2818_s19, 4  ;;  %p71_p9 = scmp.eq.s32.totalorder %s2320_s25, 0  ;;  %s664_s21 = int_to_ptr.hbm [resolvable:$true] %s663_s21 }
  0x46   : > { %1734 = dma.hbm_to_vmem [thread:$0]  (!%p2489_p6), %s664_s21, 16, %s666_s20, [#allocation23]  }
  0x47   : > { %s2844_s30 = smov (%p58_p7, %s56_s30), 0  ;;  %p2545_p10 = por %p71_p9, %p70_p8 }
  0x48   : > { %2819 = sst [smem:[#allocation36_spill]] %s2844_s30  ;;  %p76_p11 = scmp.ne.s32.totalorder %s2304_s22, %s2300_s1 }
  0x49   : > { %s60_s26 = ssub.s32 %s2316_s2, %s2844_s30  ;;  %p506_p12 = scmp.eq.s32.totalorder %s2469_s3, 1 }
  0x4a   : > { %p61_p13 = scmp.eq.s32.totalorder %s60_s26, 0  ;;  %p2556_p0 = por %p77_p1, %p76_p11 }
  0x4b   : > { %p2560_p2 = por %p506_p12, %p70_p8  ;;  %p512_p5 = scmp.eq.s32.totalorder %s1518_s27, 1 }
  0x4c   : > { %s2565_s29 = scalar_select %p61_p13, %s2308_s23, %s63_s28  }
  0x4d   : > { %p2567_p6 = por %p512_p5, %p76_p11  ;;  %p1756_p7 = scmp.lt.s32.totalorder %s2320_s25, 2 }
  0x4e   : > { %2823 = sst [smem:[#allocation37_spill]] %s2565_s29  ;;  %s676_s11 = sand.u32 1, %s2308_s23  }
  0x4f   : > { %s1532_s21 = sshll.u32 %s2316_s2, 2  ;;  %s1531_s7 = sshll.u32 %s676_s11, 2 }
  0x50   : > { %s2825_s20 = sld [smem:[#allocation38_spill]]  ;;  %s680_s13 = scalar_lea.vmem [#allocation4], %s1531_s7 }
  0x51   : > { %s688_s14 = sshll.u32 %s680_s13, 4  ;;  %p1736_p8 = pnand %p1756_p7, %p2545_p10  ;;  %s689_s14 = int_to_ptr.vmem [resolvable:$true] %s688_s14 }
  0x52   : > { %s695_s27 = sand.u32 1, %s2320_s25   ;;  %s2826_s16 = sld [smem:[#allocation39_spill]] }
  0x53   : > { %s677_s19 = scalar_lea.sflag [#allocation5], %s676_s11  ;;  %s698_s29 = scalar_lea.vmem [#allocation7], %s676_s11 }
  0x54   : > { %s705_s23 = sshll.u32 %s698_s29, 4  ;;  %s2587_s13 = sand.u32 (!%p2477_p3), 1, %s2304_s22   ;;  %s706_s23 = int_to_ptr.vmem [resolvable:$true] %s705_s23 }
  0x55   : > { %s1534_s15 = sshll.u32 (!%p2477_p3), %s2587_s13, 2 }
  0x56   : > { %s684_s26 = scalar_lea.hbm %s2825_s20, %s1532_s21  ;;  %s696_s21 = scalar_lea.sflag [#allocation8], %s695_s27 }
  0x57   : > { %s686_s9 = sshll.u32 %s684_s26, 4  ;;  %714 = sbr.rel (%p2477_p3) target bundleno = 1887 (0x75f), region = 100  ;;  %s687_s9 = int_to_ptr.hbm [resolvable:$true] %s686_s9 }
  0x58   : > { %s701_s17 = scalar_lea.hbm %s2826_s16, %s2316_s2  ;;  %s717_s16 = scalar_lea.sflag (!%p2477_p3), [#allocation5], %s2587_s13 }
  0x59   : > { %1738 = dma.hbm_to_vmem [thread:$0]  (!%p1736_p8), %s687_s9, 64, %s689_s14, %s677_s19  }
  0x5a   : > { %s703_s30 = sshll.u32 %s701_s17, 4  ;;  %s720_s12 = scalar_lea.vmem (!%p2477_p3), [#allocation4], %s1534_s15  ;;  %s704_s30 = int_to_ptr.hbm [resolvable:$true] %s703_s30 }
  0x5b   : > { %1741 = dma.hbm_to_vmem [thread:$0]  (!%p1736_p8), %s704_s30, 16, %s706_s23, %s696_s21  }
  0x5c   : > { %2263 = dma.done.wait (%p2556_p0), %s717_s16, 64  }
  0x5d   : > { %2265 = vsyncadd (%p2556_p0), %s717_s16, 4294967232  ;;  %s726_s9 = sand.u32 1, %s2469_s3   ;;  %s729_s17 = scalar_lea.vmem [#allocation7], %s2587_s13 }
  0x5e   : > { %s727_s14 = scalar_lea.sflag [#allocation8], %s726_s9 }
  0x5f   : > { %2267 = dma.done.wait (%p2556_p0), %s727_s14, 16  }
  0x60   : > { %2269 = vsyncadd (%p2556_p0), %s727_s14, 4294967280 }
  0x61   : > { %2271 = dma.done.wait (%p77_p1), [#allocation8], 16  }
  0x62   : > { %2273 = vsyncadd (%p77_p1), [#allocation8], 4294967280 }
  0x63   : > { %2275 = dma.done.wait (%p77_p1), [#allocation11], 32  }
  0x64   : > { %2277 = vsyncadd (%p77_p1), [#allocation11], 4294967264 }
  0x65   : > { %2279 = dma.done.wait (%p77_p1), [#allocation14], 32  }
  0x66   : > { %2281 = vsyncadd (%p77_p1), [#allocation14], 4294967264 }
  0x67   : > { %2283 = dma.done.wait (%p77_p1), [#allocation17], 32  }
  0x68   : > { %2285 = vsyncadd (%p77_p1), [#allocation17], 4294967264 }
  0x69   : > { %2287 = dma.done.wait (%p77_p1), [#allocation20], 32  }
  0x6a   : > { %2289 = vsyncadd (%p77_p1), [#allocation20], 4294967264 }
  0x6b   : > { %2291 = dma.done.wait (%p77_p1), [#allocation23], 16  }
  0x6c   : > { %2293 = vsyncadd (%p77_p1), [#allocation23], 4294967280  ;;  %s2827_s4 = sld [smem:[#allocation41_spill]]  ;;  %v846_v4 = vld [vmem:[%s720_s12] sm:$0xf]  ;;  %vm867_vm0 = vcmask 261120  }
  0x6d   : > { %s2828_s29 = sld [smem:[#allocation40_spill]]  ;;  %v2637_v5 = vld [vmem:[%s720_s12] sm:$0xf]  ;;  %v1827_v6 = vld [vmem:[#allocation9] ss:$0 sm:$0xff]  ;;  %vm918_vm1 = vcmask 257024  }
  0x6e   : > { %v1828_v12 = vld [vmem:[%s2762_s6] ss:$0 sm:$0xff]  ;;  %s2829_s28 = sld [smem:[#allocation42_spill]]  ;;  %vm994_vm2 = vcmask 64512   ;;  %v1829_v29 = vld [vmem:[#allocation10] ss:$0 sm:$0xff]  ;;  %v1065_v51 = vunpack.c.l.bf16 %v2637_v5 }
  0x6f   : > { %v928_v20 = vld [vmem:[%s729_s17] sm:$0x1]  ;;  %vm1011_vm3 = vcmask 1043456   ;;  %v1645_v41 = vld [vmem:[%s2761_s5 + $0x8] sm:$0xff]  ;;  %v1830_v50 = vld [vmem:[#allocation12] ss:$0 sm:$0xff] }
  0x70   : > { %v929_v21 = vsub.f32 1.0, %v928_v20  ;;  %v1644_v42 = vld [vmem:[%s2761_s5] sm:$0xff]  ;;  %v2332_v57 = vmov 32.0   ;;  %s2830_s23 = sld [smem:[#allocation46_spill]]  ;;  %v1832_v20 = vld [vmem:[#allocation18] ss:$0 sm:$0xff] }
  0x71   : > { %s2832_s18 = sld [smem:[#allocation48_spill]]  ;;  %s1545_s21 = sshll.u32 %s2587_s13, 3 }
  0x72   : > { %v1639_v0 = vld [vmem:[%s2827_s4 + $0x8] sm:$0xff]  ;;  %v1638_v2 = vld [vmem:[%s2827_s4] sm:$0xff]  ;;  %v930_v22 = vmul.f32 -1e+09, %v929_v21  ;;  %s2833_s8 = sld [smem:[#allocation54_spill]]  ;;  %s840_s14 = scalar_lea.vmem [#allocation24], %s1545_s21 }
  0x73   : > { %v1643_v1 = vld [vmem:[%s2828_s29 + $0x8] sm:$0xff]  ;;  %877 = vmatpush.bf16.msra.mxu0 %v1639_v0  ;;  %v1642_v3 = vld [vmem:[%s2828_s29] sm:$0xff]  ;;  %s2834_s26 = sld [smem:[#allocation35_spill]]  ;;  %s1319_s17 = sshll.u32 %s840_s14, 4  ;;  %s1320_s17 = int_to_ptr.vmem [resolvable:$true] %s1319_s17 }
  0x74   : > { %961 = vmatpush.bf16.msra.mxu2 %v1643_v1  ;;  %v1641_v18 = vld [vmem:[%s2829_s28 + $0x8] sm:$0xff]  ;;  %v1640_v19 = vld [vmem:[%s2829_s28] sm:$0xff]  ;;  %v991_v23 = vperm.slane %v930_v22, 0  ;;  %s2835_s12 = sld [smem:[#allocation56_spill]] }
  0x75   : > { %910 = vmatpush.bf16.msra.mxu1 %v1641_v18 }
  0x76   : > { %s2831_s30 = smov %s2830_s23 }
  0x77   : > { %878 = vmatpush.bf16.msra.mxu0 %v1638_v2 }
  0x78   : > { %962 = vmatpush.bf16.msra.mxu2 %v1642_v3 }
  0x79   : > { %911 = vmatpush.bf16.msra.mxu1 %v1640_v19  ;;  %s1635_s27 = sshll.u32 %s2834_s26, 3 }
  0x7a   : > { %1554 = vmatmul.msk.bf16.vlgmr.msra.gmra.mxu0 %vm867_vm0, %v846_v4  ;;  %s1317_s9 = scalar_lea.hbm %s2835_s12, %s1635_s27  ;;  %s2230_s20 = scalar_lea.hbm %s2835_s12, 16 }
  0x7b   : > { %1572 = vmatmul.msk.bf16.vlgmr.msra.gmra.mxu2 %vm867_vm0, %v2637_v5  ;;  %v1647_v5 = vld [vmem:[%s2830_s23 + $0x8] sm:$0xff]  ;;  %s1321_s19 = sshll.u32 %s1317_s9, 4  ;;  %s1306_s23 = scalar_lea.sflag [#allocation6], %s2587_s13  ;;  %s1322_s19 = int_to_ptr.hbm [resolvable:$true] %s1321_s19 }
  0x7c   : > { %1563 = vmatmul.msk.bf16.vlgmr.msra.gmra.mxu1 %vm867_vm0, %v846_v4  ;;  %1136 = vmatpush.bf16.msrb.mxu2 %v1647_v5  ;;  %s2224_s0 = sshra.s32 %s1322_s19, 4  ;;  %s2225_s0 = int_to_ptr.hbm [resolvable:$true] %s2224_s0 }
  0x7d   : > { %1058 = vmatpush.bf16.msrb.mxu1 %v1645_v41  ;;  %s2226_s11 = scalar_lea.hbm %s2225_s0, 8  ;;  %p2231_p10 = scmp.lt.s32.totalorder %s2225_s0, %s2835_s12 }
  0x7e   : > { %p2227_p1 = scmp.ne.s32.totalorder %s2225_s0, %s2226_s11  ;;  %p2232_p11 = scmp.lt.s32.totalorder %s2230_s20, %s2226_s11 }
  0x80   : > { %p2228_p3 = pnand %p2227_p1, %p2560_p2  ;;  %p2233_p12 = por %p2232_p11, %p2231_p10 }
  0x81   : > { %1059 = vmatpush.bf16.msrb.mxu1 %v1644_v42 }
  0x82   : > { %p2229_p9 = pneg %p2228_p3 }
  0x84   : > { %p2234_p13 = pnand %p2233_p12, %p2229_p9 }
  0xf7   : > { %v880_v7 = vpop.f32.mrf.mxu0 }
  0xf8   : > { %v881_v8 = vadd.f32 %v1827_v6, %v880_v7  ;;  %v1646_v6 = vld [vmem:[%s2831_s30] sm:$0xff]  ;;  %v1655_v7 = vld [vmem:[%s2832_s18 + $0x38] sm:$0xff] }
  0xf9   : > { %v913_v30 = vpop.f32.mrf.mxu1  ;;  %1137 = vmatpush.bf16.msrb.mxu2 %v1646_v6 }
  0xfa   : > { %v917_v9 = vpack.c.bf16 %v881_v8, %v881_v8  ;;  %v914_v31 = vadd.f32 %v1829_v29, %v913_v30  ;;  %v1649_v29 = vld [vmem:[%s2832_s18 + $0x8] sm:$0xff]  ;;  %v1648_v30 = vld [vmem:[%s2832_s18] sm:$0xff] }
  0xfc   : > { %919 = vst.msk [vmem:[#allocation2] sm:$0xf] %vm918_vm1, %v917_v9  ;;  %v920_v32 = vpack.c.bf16 %v914_v31, %v914_v31  ;;  %v1833_v31 = vld [vmem:[#allocation13] ss:$0 sm:$0xff] }
  0xfe   : > { %v964_v10 = vpop.f32.mrf.mxu2  ;;  %921 = vst.msk [vmem:[#allocation3] sm:$0xf] %vm918_vm1, %v920_v32 }
  0xff   : > { %v882_v11 = vpop.f32.mrf.mxu0  ;;  %v965_v14 = vadd.f32 %v1828_v12, %v964_v10 }
 0x101   : > { %v968_v17 = vpack.c.bf16 %v965_v14, %v965_v14  ;;  %v915_v33 = vpop.f32.mrf.mxu1 }
 0x103   : > { %v969_v13 = vld [vmem:[#allocation2] sm:$0xf] }
 0x104   : > { %v974_v15 = vsel %vm867_vm0, %v969_v13, 0 }
 0x105   : > { %983 = vmatpush.bf16.xpose.msra.mxu3 %v974_v15  ;;  %v1007_v36 = vld [vmem:[#allocation3] sm:$0xf] }
 0x106   : > { %v966_v16 = vpop.f32.mrf.mxu2  ;;  %v1013_v37 = vsel %vm1011_vm3, %v1007_v36, 0 }
 0x107   : > { %1022 = vmatpush.bf16.msrb.mxu0 %v1013_v37 }
 0x10c   : > { %1573 = vmatmul.msk.bf16.vlgmr.msra.gmra.mxu3 %vm867_vm0, %v968_v17  ;;  %v1831_v17 = vld [vmem:[#allocation16] ss:$0 sm:$0xff] }
 0x10d   : > { %1221 = vmatpush.bf16.msrb.mxu3 %v1655_v7  ;;  %v1836_v7 = vld [vmem:[#allocation21] ss:$0 sm:$0xff] }
 0x18f   : > { %v985_v24 = vpop.f32.mrf.mxu3 }
 0x190   : > { %v989_v25 = vmul.f32 0.17677669, %v985_v24  ;;  %v1654_v24 = vld [vmem:[%s2832_s18 + $0x30] sm:$0xff] }
 0x191   : > { %1222 = vmatpush.bf16.msrb.mxu3 %v1654_v24 }
 0x192   : > { %v993_v26 = vadd.f32 %v991_v23, %v989_v25  ;;  %v1653_v25 = vld [vmem:[%s2832_s18 + $0x28] sm:$0xff] }
 0x194   : > { %v995_v27 = vsel %vm994_vm2, %v993_v26, -inf }
 0x195   : > { %996 = vmax.xlane.f32.xlu0 %v995_v27  ;;  %1223 = vmatpush.bf16.msrb.mxu3 %v1653_v25  ;;  %v1651_v27 = vld [vmem:[%s2832_s18 + $0x18] sm:$0xff] }
 0x197   : > { %v987_v28 = vpop.f32.mrf.mxu3 }
 0x198   : > { %v1650_v28 = vld [vmem:[%s2832_s18 + $0x10] sm:$0xff] }
 0x208   : > { %v997_v34 = vpop.xlane.xlu0 %996 }
 0x209   : > { %v998_v35 = vsub.f32 %v993_v26, %v997_v34  ;;  %v1652_v26 = vld [vmem:[%s2832_s18 + $0x20] sm:$0xff] }
 0x20a   : > { %1224 = vmatpush.bf16.msrb.mxu3 %v1652_v26 }
 0x20b   : > { %v999_v38 = vmul.f32 1.442695, %v998_v35 }
 0x20d   : > { %1838 = vpow2.f32 %v999_v38 }
 0x20e   : > { %1225 = vmatpush.bf16.msrb.mxu3 %v1651_v27 }
 0x212   : > { %1226 = vmatpush.bf16.msrb.mxu3 %v1650_v28 }
 0x213   : > { %v1839_v39 = vpop.eup %1838 }
 0x214   : > { %v1001_v40 = vsel %vm994_vm2, %v1839_v39, 0.0 }
 0x215   : > { %1002 = vadd.xlane.f32.xlu0 %v1001_v40 }
 0x216   : > { %1227 = vmatpush.bf16.msrb.mxu3 %v1649_v29 }
 0x21a   : > { %1228 = vmatpush.bf16.msrb.mxu3 %v1648_v30 }
 0x288   : > { %v1003_v43 = vpop.xlane.xlu0 %1002 }
 0x289   : > { %1840 = vrcp.f32 %v1003_v43 }
 0x28a   : > { %1842 = vrcp.f32 %v2332_v57  ;;  %v1656_v57 = vld [vmem:[%s2833_s8] sm:$0xff] }
 0x28f   : > { %v1841_v44 = vpop.eup %1840 }
 0x290   : > { %v1005_v45 = vmul.f32 %v1841_v44, %v1839_v39  ;;  %v1843_v58 = vpop.eup %1842 }
 0x291   : > { %v1071_v59 = vmul.f32 32.0, %v1843_v58  ;;  %vm1075_vm4 = vweird.f32 %v1843_v58 }
 0x292   : > { %v1006_v46 = vpack.c.bf16 %v1005_v45, %v1005_v45  ;;  %v1834_v45 = vld [vmem:[#allocation15] ss:$0 sm:$0xff] }
 0x293   : > { %v1072_v60 = vsub.f32 1.0, %v1071_v59 }
 0x294   : > { %1574 = vmatmul.msk.bf16.vlgmr.msrb.gmra.mxu0 %vm994_vm2, %v1006_v46 }
 0x295   : > { %v1073_v61 = vmul.f32 %v1843_v58, %v1072_v60 }
 0x297   : > { %v1074_v62 = vadd.f32 %v1843_v58, %v1073_v61 }
 0x299   : > { %v2670_v63 = vsel %vm1075_vm4, %v1843_v58, %v1074_v62 }
 0x311   : > { %v1024_v47 = vpop.f32.mrf.mxu0 }
 0x312   : > { %v1028_v48 = vpack.c.bf16 %v1024_v47, %v1024_v47 }
 0x314   : > { %1583 = vmatmul.msk.bf16.vlgmr.msrb.gmra.mxu1 %vm867_vm0, %v1028_v48 }
 0x319   : > { %v1026_v49 = vpop.f32.mrf.mxu0 }
 0x391   : > { %v1061_v52 = vpop.f32.mrf.mxu1 }
 0x392   : > { %v1062_v53 = vadd.f32 %v1830_v50, %v1061_v52 }
 0x394   : > { %v1066_v54 = vadd.f32 %v1065_v51, %v1062_v53 }
 0x396   : > { %v1067_v55 = vsel %vm867_vm0, %v1066_v54, 0.0 }
 0x397   : > { %1068 = vadd.xlane.f32.xlu1 %v1067_v55 }
 0x399   : > { %v1063_v56 = vpop.f32.mrf.mxu1 }
 0x39a   : > { %v1657_v56 = vld [vmem:[%s2833_s8 + $0x8] sm:$0xff] }
 0x39b   : > { %1297 = vmatpush.bf16.msra.mxu0 %v1657_v56 }
 0x39f   : > { %1298 = vmatpush.bf16.msra.mxu0 %v1656_v57 }
 0x40a   : > { %v1069_v0 = vpop.xlane.xlu1 %1068 }
 0x40b   : > { %v1077_v1 = vmul.f32 %v2670_v63, %v1069_v0 }
 0x40d   : > { %v1078_v2 = vsub.f32 %v1066_v54, %v1077_v1 }
 0x40f   : > { %v1079_v3 = vmul.f32 %v1078_v2, %v1078_v2 }
 0x411   : > { %v1080_v4 = vsel %vm867_vm0, %v1079_v3, 0.0 }
 0x412   : > { %1081 = vadd.xlane.f32.xlu1 %v1080_v4  ;;  %v1835_v4 = vld [vmem:[#allocation19] ss:$0 sm:$0xff] }
 0x485   : > { %v1082_v8 = vpop.xlane.xlu1 %1081 }
 0x486   : > { %v1083_v9 = vmul.f32 %v1082_v8, %v2670_v63 }
 0x488   : > { %v1084_v10 = vadd.f32 1e-12, %v1083_v9 }
 0x48a   : > { %1844 = vrsqrt.f32 %v1084_v10  ;;  %vm1091_vm6 = vweird.f32 %v1084_v10 }
 0x490   : > { %v1845_v11 = vpop.eup %1844 }
 0x491   : > { %v1086_v12 = vmul.f32 %v1845_v11, %v1084_v10  ;;  %vm1092_vm5 = vweird.f32 %v1845_v11  ;;  %v1837_v10 = vld [vmem:[#allocation22] ss:$0 sm:$0xff] }
 0x492   : > { %vm1093_vm7 = vmor %vm1091_vm6, %vm1092_vm5 }
 0x493   : > { %v1087_v13 = vmul.f32 %v1845_v11, %v1086_v12 }
 0x495   : > { %v1088_v14 = vmul.f32 0.5, %v1087_v13 }
 0x497   : > { %v1089_v15 = vsub.f32 1.5, %v1088_v14 }
 0x499   : > { %v1090_v16 = vmul.f32 %v1845_v11, %v1089_v15 }
 0x49b   : > { %v1094_v18 = vsel %vm1093_vm7, %v1845_v11, %v1090_v16 }
 0x49c   : > { %v1095_v19 = vmul.f32 %v1094_v18, %v1078_v2 }
 0x49e   : > { %v1100_v21 = vmul.f32 %v1831_v17, %v1095_v19 }
 0x4a0   : > { %v1105_v22 = vadd.f32 %v1832_v20, %v1100_v21 }
 0x4a2   : > { %v1106_v23 = vpack.c.bf16 %v1105_v22, %v1105_v22 }
 0x4a4   : > { %1592 = vmatmul.msk.bf16.vlgmr.msrb.gmra.mxu2 %vm867_vm0, %v1106_v23 }
 0x527   : > { %v1139_v32 = vpop.f32.mrf.mxu2 }
 0x528   : > { %v1140_v33 = vadd.f32 %v1833_v31, %v1139_v32 }
 0x52a   : > { %v1143_v34 = vmul.f32 %v1140_v33, %v1140_v33 }
 0x52c   : > { %v1144_v35 = vmul.f32 %v1143_v34, %v1140_v33 }
 0x52e   : > { %v1145_v36 = vmul.f32 0.044715, %v1144_v35 }
 0x52f   : > { %v1141_v37 = vpop.f32.mrf.mxu2 }
 0x530   : > { %v1146_v38 = vadd.f32 %v1145_v36, %v1140_v33 }
 0x532   : > { %v1147_v39 = vmul.f32 0.7978846, %v1146_v38 }
 0x534   : > { %1846 = vtanh.f32 %v1147_v39 }
 0x53a   : > { %v1847_v40 = vpop.eup %1846 }
 0x53b   : > { %v1149_v41 = vadd.f32 1.0, %v1847_v40 }
 0x53d   : > { %v1150_v42 = vmul.f32 0.5, %v1149_v41 }
 0x53f   : > { %v1151_v43 = vmul.f32 %v1150_v42, %v1140_v33 }
 0x541   : > { %v1152_v44 = vpack.c.bf16 %v1151_v43, %v1151_v43 }
 0x543   : > { %1229 = vmatmul.bf16.vlgmr.msrb.gmra.mxu3 %v1152_v44 }
 0x5c6   : > { %v1230_v46 = vpop.f32.mrf.mxu3 }
 0x5c7   : > { %v1231_v47 = vadd.f32 %v1834_v45, %v1230_v46 }
 0x5c9   : > { %v1234_v48 = vadd.f32 %v1231_v47, %v1105_v22 }
 0x5cb   : > { %v1235_v49 = vsel %vm867_vm0, %v1234_v48, 0.0 }
 0x5cc   : > { %1236 = vadd.xlane.f32.xlu2 %v1235_v49 }
 0x5ce   : > { %v1232_v50 = vpop.f32.mrf.mxu3 }
 0x63f   : > { %v1237_v51 = vpop.xlane.xlu2 %1236 }
 0x640   : > { %v1238_v52 = vmul.f32 %v1237_v51, %v2670_v63 }
 0x642   : > { %v1239_v53 = vsub.f32 %v1234_v48, %v1238_v52 }
 0x644   : > { %v1240_v54 = vmul.f32 %v1239_v53, %v1239_v53 }
 0x646   : > { %v1241_v55 = vsel %vm867_vm0, %v1240_v54, 0.0 }
 0x647   : > { %1242 = vadd.xlane.f32.xlu2 %v1241_v55 }
 0x6ba   : > { %v1243_v58 = vpop.xlane.xlu2 %1242 }
 0x6bb   : > { %v1244_v59 = vmul.f32 %v1243_v58, %v2670_v63 }
 0x6bd   : > { %v1245_v60 = vadd.f32 1e-12, %v1244_v59 }
 0x6bf   : > { %1848 = vrsqrt.f32 %v1245_v60  ;;  %vm1252_vm9 = vweird.f32 %v1245_v60 }
 0x6c5   : > { %v1849_v61 = vpop.eup %1848 }
 0x6c6   : > { %v1247_v62 = vmul.f32 %v1849_v61, %v1245_v60  ;;  %vm1253_vm8 = vweird.f32 %v1849_v61 }
 0x6c7   : > { %vm1254_vm10 = vmor %vm1252_vm9, %vm1253_vm8 }
 0x6c8   : > { %v1248_v0 = vmul.f32 %v1849_v61, %v1247_v62 }
 0x6ca   : > { %v1249_v1 = vmul.f32 0.5, %v1248_v0 }
 0x6cc   : > { %v1250_v2 = vsub.f32 1.5, %v1249_v1 }
 0x6ce   : > { %v1251_v3 = vmul.f32 %v1849_v61, %v1250_v2 }
 0x6d0   : > { %v1255_v5 = vsel %vm1254_vm10, %v1849_v61, %v1251_v3 }
 0x6d1   : > { %v1256_v6 = vmul.f32 %v1255_v5, %v1239_v53 }
 0x6d3   : > { %v1261_v8 = vmul.f32 %v1835_v4, %v1256_v6 }
 0x6d5   : > { %v1266_v63 = vadd.f32 %v1836_v7, %v1261_v8 }
 0x6d7   : > { %v1267_v9 = vpack.c.bf16 %v1266_v63, %v1266_v63 }
 0x6d9   : > { %1633 = vmatmul.msk.bf16.vlgmr.msra.gmra.mxu0 %vm867_vm0, %v1267_v9 }
 0x756   : > { %v1300_v11 = vpop.f32.mrf.mxu0 }
 0x757   : > { %v1301_v12 = vadd.f32 %v1837_v10, %v1300_v11 }
 0x759   : > { %1304 = vst [vmem:[%s840_s14] sm:$0xff] %v1301_v12 }
 0x75a   : > { %2237 = shalt.err (!%p2234_p13)
}
 0x75b   : > { %1702 = dma.vmem_to_hbm [thread:$0]  (%p2560_p2), %s1320_s17, 128, %s1322_s19, %s1306_s23  }
 0x75e   : > { %v1302_v13 = vpop.f32.mrf.mxu0 }
 0x75f PF: > { %s1333_s13 = sand.u32 1, %s2300_s1   ;;  %p1743_p0 = pnand %p1530_p4, %p2567_p6 }
 0x760   : > { %s1334_s21 = scalar_lea.sflag [#allocation6], %s1333_s13 }
 0x761   : > { %p1744_p5 = pneg %p1743_p0 }
 0x763   : > { %2295 = dma.done.wait (%p1744_p5), %s1334_s21, 128  }
 0x764   : > { %2297 = vsyncadd (%p1744_p5), %s1334_s21, 4294967168  ;;  %s44_s25 = sadd.s32 1, %s2320_s25   ;;  %s2836_s15 = sld [smem:[#allocation34_spill]] }
 0x765   : > { %p41_p7 = scmp.ge.s32.totalorder %s44_s25, 4   ;;  %s2837_s23 = sld [smem:[#allocation37_spill]] }
 0x766   : > { %s2838_s10 = sld [smem:[#allocation36_spill]]  ;;  %s2839_s1 = smov %s2304_s22 }
 0x767   : > { %s2841_s24 = smov %s2316_s2 }
 0x768   :  { %43 = sbr.rel (!%p41_p7) target bundleno = 33 (0x21), region = 203 }
 0x76a   : > { %s2840_s22 = smov %s2836_s15 }
 0x76c   : > { %s2842_s2 = smov %s2838_s10 }
 0x76d   :  { %1340 = vsyncpa [#allocation5], 1 }
 0x76e   :  { %1342 = vsyncpa [#allocation5 + $0x1], 1 }
 0x76f   :  { %1343 = vsyncpa [#allocation8], 1 }
 0x770   :  { %1345 = vsyncpa [#allocation8 + $0x1], 1 }
 0x771   :  { %1346 = vsyncpa [#allocation11], 1 }
 0x772   :  { %1347 = vsyncpa [#allocation14], 1 }
 0x773   :  { %1348 = vsyncpa [#allocation17], 1 }
 0x774   :  { %1349 = vsyncpa [#allocation20], 1 }
 0x775   :  { %1350 = vsyncpa [#allocation23], 1 }
 0x776   :  { %1351 = vsyncpa [#allocation6], 1 }
 0x777   :  { %1353 = vsyncpa [#allocation6 + $0x1], 1 }

</bundles_post_ra>
